<compile_context>
chip_gen: v7x
topology: tpu7x:2x2x1
jax: 0.10.0
libtpu: 0.0.40
codegen_flags: <defaults>
</compile_context>

<pallas_src>
import math
import functools

import jax
import jax.numpy as jnp
from jax import lax
from jax.experimental import pallas as pl
from jax.experimental.pallas import tpu as pltpu


def _self_attention_kernel(x_ref, gamma_ref, beta_ref, gmap_ref,
                           wq_ref, wkv_ref, wout_ref, bout_ref,
                           o_ref,
                           normed_scr, kv_scr, acc_scr,
                           *, n_head, head_dim, eps, tq, grp_count, exp_dtype):
    hd = head_dim
    S, Cp = normed_scr.shape
    t = pl.program_id(1)
    q_start = pl.multiple_of(t * tq, tq)

    # ---------- once per batch item: GroupNorm + K|V projection into scratch ----------
    # gmap is a (Cp, G) one-hot channel->group matrix (zero rows for padded
    # channels), so group stats are tiny matmuls and the zero-padded lanes are
    # excluded automatically.
    @pl.when(t == 0)
    def _():
        x = x_ref[0]                                                         # (S, Cp) f32
        gmap = gmap_ref[...]                                                 # (Cp, G)
        ch_sum = jnp.sum(x, axis=0, keepdims=True)                           # (1, Cp)
        g_mean = jnp.dot(ch_sum, gmap, preferred_element_type=jnp.float32) / grp_count
        mean_c = jnp.dot(g_mean, gmap.T, preferred_element_type=jnp.float32)  # (1, Cp)
        cent = x - mean_c
        ch_sq = jnp.sum(cent * cent, axis=0, keepdims=True)                   # two-pass var
        g_var = jnp.dot(ch_sq, gmap, preferred_element_type=jnp.float32) / grp_count
        var_c = jnp.dot(g_var, gmap.T, preferred_element_type=jnp.float32)
        inv_std = lax.rsqrt(var_c + eps)
        normed_bf = ((cent * inv_std) * gamma_ref[...] + beta_ref[...]).astype(jnp.bfloat16)
        normed_scr[...] = normed_bf                                          # (S, Cp) bf16
        kv_scr[...] = jnp.dot(normed_bf, wkv_ref[...],
                              preferred_element_type=jnp.float32).astype(jnp.bfloat16)

    # ---------- per query tile: Q projection + flash-style attention ----------
    normed_tile = normed_scr[pl.ds(q_start, tq), :]                          # (tq, Cp) bf16
    q_all = jnp.dot(normed_tile, wq_ref[...],                                # scale baked in
                    preferred_element_type=jnp.float32).astype(jnp.bfloat16)  # (tq, C)
    kv_all = kv_scr[...]                                                     # (S, 2C) bf16
    wout_bf = wout_ref[...]                                                  # (C, Cp) bf16

    def attend(h):
        qh = q_all[:, h * hd:(h + 1) * hd]                                   # (tq, hd)
        kh = kv_all[:, 2 * h * hd: 2 * h * hd + hd]                          # (S, hd)
        vh = kv_all[:, 2 * h * hd + hd: 2 * (h + 1) * hd]                    # (S, hd)
        # contract the last dim of both operands -> no explicit kh transpose
        s = lax.dot_general(qh, kh, (((1,), (1,)), ((), ())),
                            preferred_element_type=jnp.float32)              # (tq, S) f32
        m = jnp.max(s, axis=-1, keepdims=True)
        p = jnp.exp((s - m).astype(exp_dtype))                               # EUP; bf16 on v6e/v7x
        denom = jnp.sum(p.astype(jnp.float32), axis=-1, keepdims=True)       # f32 row sum
        inv = pl.reciprocal(denom, approx=True)                              # (tq, 1)
        return jnp.dot(p.astype(jnp.bfloat16), vh,
                       preferred_element_type=jnp.float32) * inv             # (tq, hd) f32

    if hd % 128 == 0:
        # lane-aligned head packing -> single well-shaped output projection
        packed = jnp.concatenate(
            [attend(h).astype(jnp.bfloat16) for h in range(n_head)], axis=1)  # (tq, C)
        acc_scr[...] = jnp.dot(packed, wout_bf, preferred_element_type=jnp.float32)
    else:
        acc_scr[...] = jnp.zeros_like(acc_scr)
        for h in range(n_head):                       # n_head is small; acc in VMEM scratch
            acc_scr[...] += jnp.dot(attend(h).astype(jnp.bfloat16),
                                    wout_bf[h * hd:(h + 1) * hd, :],
                                    preferred_element_type=jnp.float32)       # (tq, Cp)

    x_tile = x_ref[0, pl.ds(q_start, tq), :]                                  # residual
    o_ref[0] = (acc_scr[...] + bout_ref[...] + x_tile).astype(o_ref.dtype)


def self_attention_pallas(x_nchw, gamma, beta, w_qkv, w_out, b_out,
                          *, n_head, norm_groups, eps=1e-5, tq=None):
    """x_nchw: (B, C, H, W) float32.  Weights in PyTorch conv layout:
       w_qkv (3C, C), w_out (C, C), b_out (C,)."""
    B, C, H, W = x_nchw.shape
    S = H * W
    hd = C // n_head
    G = norm_groups
    assert C % n_head == 0 and C % G == 0
    scale = 1.0 / math.sqrt(C)

    # lane-dense channel padding (padding is zero-filled and inert)
    Cp = ((C + 127) // 128) * 128

    # chip-dependent choices (bf16 exp only where the EUP supports it)
    kind = ""
    try:
        kind = jax.devices()[0].device_kind.lower()
    except Exception:
        pass
    exp_dtype = jnp.bfloat16 if ("v6" in kind or "v7" in kind) else jnp.float32

    # query-tile size: largest power-of-two multiple of 8 dividing S, capped
    # lower on v7x (64 MiB VMEM) for very long sequences.
    if tq is None:
        cap = 256 if ("v7" in kind and S >= 2048) else 1024
        tq = S
        for cand in (1024, 512, 256, 128, 64, 32, 16, 8):
            if cand <= cap and S % cand == 0:
                tq = cand
                break
    if S % tq != 0 or (tq % 8 != 0 and tq != S):
        tq = S
    n_qt = S // tq

    # glue: NCHW -> (B, S, Cp)
    x_bsc = jnp.transpose(x_nchw.reshape(B, C, S), (0, 2, 1))
    x_bsc = jnp.pad(x_bsc, ((0, 0), (0, 0), (0, Cp - C)))

    # glue: pack projection weights head-contiguously following torch's
    # view(B, n_head, head_dim*3, H, W).chunk(3, dim=2) channel ordering;
    # bake 1/sqrt(C) into the Q columns; zero-pad the input-channel rows
    # (Q/KV) and output-channel columns (out proj) to Cp; cast to bf16.
    wq_cols, wkv_cols = [], []
    for h in range(n_head):
        base = h * 3 * hd
        wq_cols.append(w_qkv[base:base + hd, :].T * scale)        # (C, hd)
        wkv_cols.append(w_qkv[base + hd:base + 2 * hd, :].T)      # k
        wkv_cols.append(w_qkv[base + 2 * hd:base + 3 * hd, :].T)  # v
    wq_packed = jnp.pad(jnp.concatenate(wq_cols, axis=1),
                        ((0, Cp - C), (0, 0))).astype(jnp.bfloat16)      # (Cp, C)
    wkv_packed = jnp.pad(jnp.concatenate(wkv_cols, axis=1),
                         ((0, Cp - C), (0, 0))).astype(jnp.bfloat16)     # (Cp, 2C)
    wout_packed = jnp.pad(w_out.T, ((0, 0), (0, Cp - C))).astype(jnp.bfloat16)  # (C, Cp)

    b_out_r = jnp.pad(b_out, (0, Cp - C)).reshape(1, Cp).astype(jnp.float32)
    gamma_r = jnp.pad(gamma, (0, Cp - C)).reshape(1, Cp).astype(jnp.float32)
    beta_r = jnp.pad(beta, (0, Cp - C)).reshape(1, Cp).astype(jnp.float32)

    # channel -> group one-hot membership (zero rows for padded channels)
    ch_group = jnp.arange(C) // (C // G)
    gmap = jax.nn.one_hot(ch_group, G, dtype=jnp.float32)
    gmap = jnp.pad(gmap, ((0, Cp - C), (0, 0)))                          # (Cp, G)
    grp_count = float(S * (C // G))                                      # real elems per group

    # VMEM budget: blocks (double-buffered) + weights + persistent scratch + transients
    f32b, bf16b = 4, 2
    expb = 2 if exp_dtype == jnp.bfloat16 else 4
    est = (2 * S * Cp * f32b                              # x block
           + 2 * tq * Cp * f32b                           # out block
           + 2 * (Cp * C * bf16b + Cp * 2 * C * bf16b + C * Cp * bf16b
                  + Cp * G * f32b + 3 * Cp * f32b)        # params
           + S * Cp * bf16b + S * 2 * C * bf16b + tq * Cp * f32b   # persistent scratch
           + 2 * S * Cp * f32b + S * 2 * C * f32b         # t==0 transients (cent/normed, kv f32)
           + tq * C * (f32b + bf16b)                      # q_all
           + tq * S * (f32b + expb + bf16b)               # scores + probs (one head live)
           + tq * hd * (f32b + bf16b))
    vmem_cap = 64 * 2**20
    try:
        info = pltpu.get_tpu_info()
        vmem_cap = int(getattr(info, "vmem_capacity_bytes", vmem_cap))
    except Exception:
        pass
    vmem_limit = int(min(int(0.85 * vmem_cap), max(32 * 2**20, 2 * est)))

    kernel = functools.partial(_self_attention_kernel,
                               n_head=n_head, head_dim=hd, eps=eps, tq=tq,
                               grp_count=grp_count, exp_dtype=exp_dtype)

    out_bsc = pl.pallas_call(
        kernel,
        out_shape=jax.ShapeDtypeStruct((B, S, Cp), jnp.float32),
        grid_spec=pltpu.PrefetchScalarGridSpec(
            num_scalar_prefetch=0,
            grid=(B, n_qt),
            in_specs=[
                pl.BlockSpec((1, S, Cp), lambda b, t: (b, 0, 0)),      # x (resident over t)
                pl.BlockSpec((1, Cp), lambda b, t: (0, 0)),            # gamma
                pl.BlockSpec((1, Cp), lambda b, t: (0, 0)),            # beta
                pl.BlockSpec((Cp, G), lambda b, t: (0, 0)),            # group map
                pl.BlockSpec((Cp, C), lambda b, t: (0, 0)),            # wq packed (bf16)
                pl.BlockSpec((Cp, 2 * C), lambda b, t: (0, 0)),        # wkv packed (bf16)
                pl.BlockSpec((C, Cp), lambda b, t: (0, 0)),            # w_out^T (bf16)
                pl.BlockSpec((1, Cp), lambda b, t: (0, 0)),            # b_out
            ],
            out_specs=pl.BlockSpec((1, tq, Cp), lambda b, t: (b, t, 0)),
            scratch_shapes=[
                pltpu.VMEM((S, Cp), jnp.bfloat16),        # cached GroupNorm output
                pltpu.VMEM((S, 2 * C), jnp.bfloat16),     # cached K|V projection
                pltpu.VMEM((tq, Cp), jnp.float32),        # output-projection accumulator
            ],
        ),
        # batch axis sharded across TensorCores; query-tile axis sequential so
        # the per-batch scratch cache is valid on the core that filled it.
        compiler_params=pltpu.CompilerParams(
            dimension_semantics=("parallel", "arbitrary"),
            vmem_limit_bytes=vmem_limit),
    )(x_bsc, gamma_r, beta_r, gmap, wq_packed, wkv_packed, wout_packed, b_out_r)

    # glue: drop channel padding, (B, S, C) -> NCHW
    out_bsc = out_bsc[:, :, :C]
    return jnp.transpose(out_bsc, (0, 2, 1)).reshape(B, C, H, W)


def self_attention_reference(x, gamma, beta, w_qkv, w_out, b_out,
                             *, n_head, norm_groups, eps=1e-5):
    """Pure-JAX f32 mirror of the PyTorch forward (NCHW), for verification."""
    B, C, H, W = x.shape
    hd = C // n_head
    xg = x.reshape(B, norm_groups, C // norm_groups, H, W)
    mean = xg.mean(axis=(2, 3, 4), keepdims=True)
    var = xg.var(axis=(2, 3, 4), keepdims=True)
    normed = (xg - mean) / jnp.sqrt(var + eps)
    normed = normed.reshape(B, C, H, W) * gamma[None, :, None, None] + beta[None, :, None, None]
    qkv = jnp.einsum('oc,bchw->bohw', w_qkv, normed)
    qkv = qkv.reshape(B, n_head, hd * 3, H, W)
    q, k, v = jnp.split(qkv, 3, axis=2)
    attn = jnp.einsum('bnchw,bncyx->bnhwyx', q, k) / math.sqrt(C)
    attn = attn.reshape(B, n_head, H, W, H * W)
    attn = jax.nn.softmax(attn, axis=-1)
    attn = attn.reshape(B, n_head, H, W, H, W)
    out = jnp.einsum('bnhwyx,bncyx->bnchw', attn, v)
    out = out.reshape(B, C, H, W)
    out = jnp.einsum('oc,bchw->bohw', w_out, out) + b_out[None, :, None, None]
    return out + x


if __name__ == "__main__":
    B, C, H, W = 2, 32, 8, 8
    n_head = 2
    norm_groups = 32          # module default; C must be divisible by it

    key = jax.random.PRNGKey(0)
    k0, k1, k2, k3, k4, k5 = jax.random.split(key, 6)
    x = jax.random.normal(k0, (B, C, H, W), dtype=jnp.float32)
    gamma = 1.0 + 0.1 * jax.random.normal(k1, (C,), dtype=jnp.float32)
    beta = 0.1 * jax.random.normal(k2, (C,), dtype=jnp.float32)
    w_qkv = jax.random.normal(k3, (3 * C, C), dtype=jnp.float32) / math.sqrt(C)
    w_out = jax.random.normal(k4, (C, C), dtype=jnp.float32) / math.sqrt(C)
    b_out = 0.1 * jax.random.normal(k5, (C,), dtype=jnp.float32)

    # tq=32 -> two query tiles at S=64, exercising the scratch-cached (t>0) path.
    out = self_attention_pallas(x, gamma, beta, w_qkv, w_out, b_out,
                                n_head=n_head, norm_groups=norm_groups, tq=32)
    out = jax.block_until_ready(out)

    ref = self_attention_reference(x, gamma, beta, w_qkv, w_out, b_out,
                                   n_head=n_head, norm_groups=norm_groups)
    ref = jax.block_until_ready(ref)

    assert out.shape == (B, C, H, W)
    max_err = float(jnp.max(jnp.abs(out - ref)))
    # bf16 MXU operands (+ bf16 exp on v6e/v7x) + approx reciprocal => looser tol.
    assert jnp.allclose(out, ref, atol=5e-2, rtol=5e-2), f"max abs err {max_err}"
    print("KERNEL_OK")
</pallas_src>

<mosaic_0001>
module attributes {stable_mosaic.version = 11 : i64} {
  func.func @_self_attention_kernel(%arg0: i32, %arg1: i32, %arg2: memref<1x64x128xf32, #tpu.memory_space<vmem>>, %arg3: memref<1x128xf32, #tpu.memory_space<vmem>>, %arg4: memref<1x128xf32, #tpu.memory_space<vmem>>, %arg5: memref<128x32xf32, #tpu.memory_space<vmem>>, %arg6: memref<128x32xbf16, #tpu.memory_space<vmem>>, %arg7: memref<128x64xbf16, #tpu.memory_space<vmem>>, %arg8: memref<32x128xbf16, #tpu.memory_space<vmem>>, %arg9: memref<1x128xf32, #tpu.memory_space<vmem>>, %arg10: memref<1x32x128xf32, #tpu.memory_space<vmem>>, %arg11: memref<64x128xbf16, #tpu.memory_space<vmem>>, %arg12: memref<64x64xbf16, #tpu.memory_space<vmem>>, %arg13: memref<32x128xf32, #tpu.memory_space<vmem>>) attributes {dimension_semantics = [#tpu.dimension_semantics<parallel>, #tpu.dimension_semantics<arbitrary>], iteration_bounds = array<i64: 2, 2>, scalar_prefetch = 0 : i64, scratch_operands = 3 : i64, tpu.core_type = #tpu.core_type<tc>, window_params = [{transform_indices = @transform_0, window_bounds = array<i64: 1, 64, 128>}, {pipeline_mode = #tpu.pipeline_mode<synchronous>, transform_indices = @transform_1, window_bounds = array<i64: 1, 128>}, {pipeline_mode = #tpu.pipeline_mode<synchronous>, transform_indices = @transform_2, window_bounds = array<i64: 1, 128>}, {pipeline_mode = #tpu.pipeline_mode<synchronous>, transform_indices = @transform_3, window_bounds = array<i64: 128, 32>}, {pipeline_mode = #tpu.pipeline_mode<synchronous>, transform_indices = @transform_4, window_bounds = array<i64: 128, 32>}, {pipeline_mode = #tpu.pipeline_mode<synchronous>, transform_indices = @transform_5, window_bounds = array<i64: 128, 64>}, {pipeline_mode = #tpu.pipeline_mode<synchronous>, transform_indices = @transform_6, window_bounds = array<i64: 32, 128>}, {pipeline_mode = #tpu.pipeline_mode<synchronous>, transform_indices = @transform_7, window_bounds = array<i64: 1, 128>}, {transform_indices = @transform_8, window_bounds = array<i64: 1, 32, 128>}]} {
    %c32_i32 = arith.constant 32 : i32
    %0 = arith.muli %arg1, %c32_i32 : i32
    %1 = tpu.assume_multiple %0, 32 : i32
    %c0_i32 = arith.constant 0 : i32
    %2 = arith.cmpi eq, %arg1, %c0_i32 : i32
    %3 = arith.extui %2 : i1 to i32
    %c0_i32_0 = arith.constant 0 : i32
    %4 = arith.cmpi ne, %3, %c0_i32_0 : i32
    scf.if %4 {
      %c0_37 = arith.constant 0 : index
      %c0_38 = arith.constant 0 : index
      %c0_39 = arith.constant 0 : index
      %69 = vector.load %arg2[%c0_37, %c0_38, %c0_39] : memref<1x64x128xf32, #tpu.memory_space<vmem>>, vector<1x64x128xf32>
      %70 = vector.shape_cast %69 : vector<1x64x128xf32> to vector<64x128xf32>
      %c0_40 = arith.constant 0 : index
      %c0_41 = arith.constant 0 : index
      %71 = vector.load %arg5[%c0_40, %c0_41] : memref<128x32xf32, #tpu.memory_space<vmem>>, vector<128x32xf32>
      %cst_42 = arith.constant dense<0.000000e+00> : vector<128xf32>
      %72 = vector.multi_reduction <add>, %70, %cst_42 [0] : vector<64x128xf32> to vector<128xf32>
      %73 = vector.shape_cast %72 : vector<128xf32> to vector<1x128xf32>
      %cst_43 = arith.constant dense<0.000000e+00> : vector<1x32xf32>
      %74 = tpu.matmul %73, %71, %cst_43 {dimension_numbers = #tpu.dot_dimension_numbers<[1], [0], [0], [1], [0, 0, 1, 1], [], []>} : vector<1x128xf32>, vector<128x32xf32>, vector<1x32xf32> -> vector<1x32xf32>
      %cst_44 = arith.constant 6.400000e+01 : f32
      %75 = vector.broadcast %cst_44 : f32 to vector<1x32xf32>
      %76 = arith.divf %74, %75 : vector<1x32xf32>
      %77 = tpu.transpose %71, [1, 0] : vector<128x32xf32> -> vector<32x128xf32>
      %cst_45 = arith.constant dense<0.000000e+00> : vector<1x128xf32>
      %78 = tpu.matmul %76, %77, %cst_45 {dimension_numbers = #tpu.dot_dimension_numbers<[1], [0], [0], [1], [0, 0, 1, 1], [], []>} : vector<1x32xf32>, vector<32x128xf32>, vector<1x128xf32> -> vector<1x128xf32>
      %79 = vector.broadcast %78 : vector<1x128xf32> to vector<64x128xf32>
      %80 = arith.subf %70, %79 : vector<64x128xf32>
      %81 = arith.mulf %80, %80 : vector<64x128xf32>
      %cst_46 = arith.constant dense<0.000000e+00> : vector<128xf32>
      %82 = vector.multi_reduction <add>, %81, %cst_46 [0] : vector<64x128xf32> to vector<128xf32>
      %83 = vector.shape_cast %82 : vector<128xf32> to vector<1x128xf32>
      %cst_47 = arith.constant dense<0.000000e+00> : vector<1x32xf32>
      %84 = tpu.matmul %83, %71, %cst_47 {dimension_numbers = #tpu.dot_dimension_numbers<[1], [0], [0], [1], [0, 0, 1, 1], [], []>} : vector<1x128xf32>, vector<128x32xf32>, vector<1x32xf32> -> vector<1x32xf32>
      %cst_48 = arith.constant 6.400000e+01 : f32
      %85 = vector.broadcast %cst_48 : f32 to vector<1x32xf32>
      %86 = arith.divf %84, %85 : vector<1x32xf32>
      %87 = tpu.transpose %71, [1, 0] : vector<128x32xf32> -> vector<32x128xf32>
      %cst_49 = arith.constant dense<0.000000e+00> : vector<1x128xf32>
      %88 = tpu.matmul %86, %87, %cst_49 {dimension_numbers = #tpu.dot_dimension_numbers<[1], [0], [0], [1], [0, 0, 1, 1], [], []>} : vector<1x32xf32>, vector<32x128xf32>, vector<1x128xf32> -> vector<1x128xf32>
      %cst_50 = arith.constant 9.99999974E-6 : f32
      %89 = vector.broadcast %cst_50 : f32 to vector<1x128xf32>
      %90 = arith.addf %88, %89 : vector<1x128xf32>
      %91 = math.rsqrt %90 : vector<1x128xf32>
      %92 = vector.broadcast %91 : vector<1x128xf32> to vector<64x128xf32>
      %93 = arith.mulf %80, %92 : vector<64x128xf32>
      %c0_51 = arith.constant 0 : index
      %c0_52 = arith.constant 0 : index
      %94 = vector.load %arg3[%c0_51, %c0_52] : memref<1x128xf32, #tpu.memory_space<vmem>>, vector<1x128xf32>
      %95 = vector.broadcast %94 : vector<1x128xf32> to vector<64x128xf32>
      %96 = arith.mulf %93, %95 : vector<64x128xf32>
      %c0_53 = arith.constant 0 : index
      %c0_54 = arith.constant 0 : index
      %97 = vector.load %arg4[%c0_53, %c0_54] : memref<1x128xf32, #tpu.memory_space<vmem>>, vector<1x128xf32>
      %98 = vector.broadcast %97 : vector<1x128xf32> to vector<64x128xf32>
      %99 = arith.addf %96, %98 : vector<64x128xf32>
      %100 = arith.truncf %99 : vector<64x128xf32> to vector<64x128xbf16>
      %c0_55 = arith.constant 0 : index
      %c0_56 = arith.constant 0 : index
      %101 = vector.load %arg11[%c0_55, %c0_56] : memref<64x128xbf16, #tpu.memory_space<vmem>>, vector<64x128xbf16>
      tpu.vector_store %arg11[%c0_55, %c0_56], %100 {strides = array<i32>} : memref<64x128xbf16, #tpu.memory_space<vmem>>, vector<64x128xbf16>,
      %c0_57 = arith.constant 0 : index
      %c0_58 = arith.constant 0 : index
      %102 = vector.load %arg7[%c0_57, %c0_58] : memref<128x64xbf16, #tpu.memory_space<vmem>>, vector<128x64xbf16>
      %cst_59 = arith.constant dense<0.000000e+00> : vector<64x64xf32>
      %103 = tpu.matmul %100, %102, %cst_59 {dimension_numbers = #tpu.dot_dimension_numbers<[1], [0], [0], [1], [0, 0, 1, 1], [], []>} : vector<64x128xbf16>, vector<128x64xbf16>, vector<64x64xf32> -> vector<64x64xf32>
      %104 = arith.truncf %103 : vector<64x64xf32> to vector<64x64xbf16>
      %c0_60 = arith.constant 0 : index
      %c0_61 = arith.constant 0 : index
      %105 = vector.load %arg12[%c0_60, %c0_61] : memref<64x64xbf16, #tpu.memory_space<vmem>>, vector<64x64xbf16>
      tpu.vector_store %arg12[%c0_60, %c0_61], %104 {strides = array<i32>} : memref<64x64xbf16, #tpu.memory_space<vmem>>, vector<64x64xbf16>,
    } else {
    }
    %5 = arith.index_cast %1 : i32 to index
    %c0 = arith.constant 0 : index
    %6 = vector.load %arg11[%5, %c0] : memref<64x128xbf16, #tpu.memory_space<vmem>>, vector<32x128xbf16>
    %c0_1 = arith.constant 0 : index
    %c0_2 = arith.constant 0 : index
    %7 = vector.load %arg6[%c0_1, %c0_2] : memref<128x32xbf16, #tpu.memory_space<vmem>>, vector<128x32xbf16>
    %cst = arith.constant dense<0.000000e+00> : vector<32x32xf32>
    %8 = tpu.matmul %6, %7, %cst {dimension_numbers = #tpu.dot_dimension_numbers<[1], [0], [0], [1], [0, 0, 1, 1], [], []>} : vector<32x128xbf16>, vector<128x32xbf16>, vector<32x32xf32> -> vector<32x32xf32>
    %9 = arith.truncf %8 : vector<32x32xf32> to vector<32x32xbf16>
    %c0_3 = arith.constant 0 : index
    %c0_4 = arith.constant 0 : index
    %10 = vector.load %arg12[%c0_3, %c0_4] : memref<64x64xbf16, #tpu.memory_space<vmem>>, vector<64x64xbf16>
    %c0_5 = arith.constant 0 : index
    %c0_6 = arith.constant 0 : index
    %11 = vector.load %arg8[%c0_5, %c0_6] : memref<32x128xbf16, #tpu.memory_space<vmem>>, vector<32x128xbf16>
    %cst_7 = arith.constant 0.000000e+00 : f32
    %12 = vector.broadcast %cst_7 : f32 to vector<32x128xf32>
    %c0_8 = arith.constant 0 : index
    %c0_9 = arith.constant 0 : index
    %13 = vector.load %arg13[%c0_8, %c0_9] : memref<32x128xf32, #tpu.memory_space<vmem>>, vector<32x128xf32>
    tpu.vector_store %arg13[%c0_8, %c0_9], %12 {strides = array<i32>} : memref<32x128xf32, #tpu.memory_space<vmem>>, vector<32x128xf32>,
    %c0_10 = arith.constant 0 : index
    %c0_11 = arith.constant 0 : index
    %14 = vector.load %arg13[%c0_10, %c0_11] : memref<32x128xf32, #tpu.memory_space<vmem>>, vector<32x128xf32>
    %15 = vector.extract_strided_slice %9 {offsets = [0, 0], sizes = [32, 16], strides = [1, 1]} : vector<32x32xbf16> to vector<32x16xbf16>
    %16 = vector.extract_strided_slice %10 {offsets = [0, 0], sizes = [64, 16], strides = [1, 1]} : vector<64x64xbf16> to vector<64x16xbf16>
    %17 = vector.extract_strided_slice %10 {offsets = [0, 16], sizes = [64, 16], strides = [1, 1]} : vector<64x64xbf16> to vector<64x16xbf16>
    %cst_12 = arith.constant dense<0.000000e+00> : vector<32x64xf32>
    %18 = tpu.matmul %15, %16, %cst_12 {dimension_numbers = #tpu.dot_dimension_numbers<[1], [1], [0], [0], [0, 0, 1, 0], [], []>} : vector<32x16xbf16>, vector<64x16xbf16>, vector<32x64xf32> -> vector<32x64xf32>
    %cst_13 = arith.constant dense<0xFF800000> : vector<32xf32>
    %19 = vector.multi_reduction <maximumf>, %18, %cst_13 [1] : vector<32x64xf32> to vector<32xf32>
    %20 = vector.shape_cast %19 : vector<32xf32> to vector<32x1xf32>
    %21 = vector.broadcast %20 : vector<32x1xf32> to vector<32x64xf32>
    %22 = arith.subf %18, %21 : vector<32x64xf32>
    %23 = math.exp %22 : vector<32x64xf32>
    %cst_14 = arith.constant dense<0.000000e+00> : vector<32xf32>
    %24 = vector.multi_reduction <add>, %23, %cst_14 [1] : vector<32x64xf32> to vector<32xf32>
    %25 = vector.shape_cast %24 : vector<32xf32> to vector<32x1xf32>
    %26 = tpu.reciprocal %25 {approx = true} : vector<32x1xf32> -> vector<32x1xf32>
    %27 = arith.truncf %23 : vector<32x64xf32> to vector<32x64xbf16>
    %cst_15 = arith.constant dense<0.000000e+00> : vector<32x16xf32>
    %28 = tpu.matmul %27, %17, %cst_15 {dimension_numbers = #tpu.dot_dimension_numbers<[1], [0], [0], [1], [0, 0, 1, 1], [], []>} : vector<32x64xbf16>, vector<64x16xbf16>, vector<32x16xf32> -> vector<32x16xf32>
    %29 = vector.broadcast %26 : vector<32x1xf32> to vector<32x16xf32>
    %30 = arith.mulf %28, %29 : vector<32x16xf32>
    %31 = arith.truncf %30 : vector<32x16xf32> to vector<32x16xbf16>
    %32 = vector.extract_strided_slice %11 {offsets = [0, 0], sizes = [16, 128], strides = [1, 1]} : vector<32x128xbf16> to vector<16x128xbf16>
    %cst_16 = arith.constant dense<0.000000e+00> : vector<32x128xf32>
    %33 = tpu.matmul %31, %32, %cst_16 {dimension_numbers = #tpu.dot_dimension_numbers<[1], [0], [0], [1], [0, 0, 1, 1], [], []>} : vector<32x16xbf16>, vector<16x128xbf16>, vector<32x128xf32> -> vector<32x128xf32>
    %34 = arith.addf %14, %33 : vector<32x128xf32>
    %c0_17 = arith.constant 0 : index
    %c0_18 = arith.constant 0 : index
    %35 = vector.load %arg13[%c0_17, %c0_18] : memref<32x128xf32, #tpu.memory_space<vmem>>, vector<32x128xf32>
    tpu.vector_store %arg13[%c0_17, %c0_18], %34 {strides = array<i32>} : memref<32x128xf32, #tpu.memory_space<vmem>>, vector<32x128xf32>,
    %c0_19 = arith.constant 0 : index
    %c0_20 = arith.constant 0 : index
    %36 = vector.load %arg13[%c0_19, %c0_20] : memref<32x128xf32, #tpu.memory_space<vmem>>, vector<32x128xf32>
    %37 = vector.extract_strided_slice %9 {offsets = [0, 16], sizes = [32, 16], strides = [1, 1]} : vector<32x32xbf16> to vector<32x16xbf16>
    %38 = vector.extract_strided_slice %10 {offsets = [0, 32], sizes = [64, 16], strides = [1, 1]} : vector<64x64xbf16> to vector<64x16xbf16>
    %39 = vector.extract_strided_slice %10 {offsets = [0, 48], sizes = [64, 16], strides = [1, 1]} : vector<64x64xbf16> to vector<64x16xbf16>
    %cst_21 = arith.constant dense<0.000000e+00> : vector<32x64xf32>
    %40 = tpu.matmul %37, %38, %cst_21 {dimension_numbers = #tpu.dot_dimension_numbers<[1], [1], [0], [0], [0, 0, 1, 0], [], []>} : vector<32x16xbf16>, vector<64x16xbf16>, vector<32x64xf32> -> vector<32x64xf32>
    %cst_22 = arith.constant dense<0xFF800000> : vector<32xf32>
    %41 = vector.multi_reduction <maximumf>, %40, %cst_22 [1] : vector<32x64xf32> to vector<32xf32>
    %42 = vector.shape_cast %41 : vector<32xf32> to vector<32x1xf32>
    %43 = vector.broadcast %42 : vector<32x1xf32> to vector<32x64xf32>
    %44 = arith.subf %40, %43 : vector<32x64xf32>
    %45 = math.exp %44 : vector<32x64xf32>
    %cst_23 = arith.constant dense<0.000000e+00> : vector<32xf32>
    %46 = vector.multi_reduction <add>, %45, %cst_23 [1] : vector<32x64xf32> to vector<32xf32>
    %47 = vector.shape_cast %46 : vector<32xf32> to vector<32x1xf32>
    %48 = tpu.reciprocal %47 {approx = true} : vector<32x1xf32> -> vector<32x1xf32>
    %49 = arith.truncf %45 : vector<32x64xf32> to vector<32x64xbf16>
    %cst_24 = arith.constant dense<0.000000e+00> : vector<32x16xf32>
    %50 = tpu.matmul %49, %39, %cst_24 {dimension_numbers = #tpu.dot_dimension_numbers<[1], [0], [0], [1], [0, 0, 1, 1], [], []>} : vector<32x64xbf16>, vector<64x16xbf16>, vector<32x16xf32> -> vector<32x16xf32>
    %51 = vector.broadcast %48 : vector<32x1xf32> to vector<32x16xf32>
    %52 = arith.mulf %50, %51 : vector<32x16xf32>
    %53 = arith.truncf %52 : vector<32x16xf32> to vector<32x16xbf16>
    %54 = vector.extract_strided_slice %11 {offsets = [16, 0], sizes = [16, 128], strides = [1, 1]} : vector<32x128xbf16> to vector<16x128xbf16>
    %cst_25 = arith.constant dense<0.000000e+00> : vector<32x128xf32>
    %55 = tpu.matmul %53, %54, %cst_25 {dimension_numbers = #tpu.dot_dimension_numbers<[1], [0], [0], [1], [0, 0, 1, 1], [], []>} : vector<32x16xbf16>, vector<16x128xbf16>, vector<32x128xf32> -> vector<32x128xf32>
    %56 = arith.addf %36, %55 : vector<32x128xf32>
    %c0_26 = arith.constant 0 : index
    %c0_27 = arith.constant 0 : index
    %57 = vector.load %arg13[%c0_26, %c0_27] : memref<32x128xf32, #tpu.memory_space<vmem>>, vector<32x128xf32>
    tpu.vector_store %arg13[%c0_26, %c0_27], %56 {strides = array<i32>} : memref<32x128xf32, #tpu.memory_space<vmem>>, vector<32x128xf32>,
    %c0_28 = arith.constant 0 : index
    %58 = arith.index_cast %1 : i32 to index
    %c0_29 = arith.constant 0 : index
    %59 = vector.load %arg2[%c0_28, %58, %c0_29] : memref<1x64x128xf32, #tpu.memory_space<vmem>>, vector<1x32x128xf32>
    %60 = vector.shape_cast %59 : vector<1x32x128xf32> to vector<32x128xf32>
    %c0_30 = arith.constant 0 : index
    %c0_31 = arith.constant 0 : index
    %61 = vector.load %arg13[%c0_30, %c0_31] : memref<32x128xf32, #tpu.memory_space<vmem>>, vector<32x128xf32>
    %c0_32 = arith.constant 0 : index
    %c0_33 = arith.constant 0 : index
    %62 = vector.load %arg9[%c0_32, %c0_33] : memref<1x128xf32, #tpu.memory_space<vmem>>, vector<1x128xf32>
    %63 = vector.broadcast %62 : vector<1x128xf32> to vector<32x128xf32>
    %64 = arith.addf %61, %63 : vector<32x128xf32>
    %65 = arith.addf %64, %60 : vector<32x128xf32>
    %c0_34 = arith.constant 0 : index
    %c0_35 = arith.constant 0 : index
    %c0_36 = arith.constant 0 : index
    %66 = vector.load %arg10[%c0_34, %c0_35, %c0_36] : memref<1x32x128xf32, #tpu.memory_space<vmem>>, vector<1x32x128xf32>
    %67 = vector.shape_cast %66 : vector<1x32x128xf32> to vector<32x128xf32>
    %68 = vector.shape_cast %65 : vector<32x128xf32> to vector<1x32x128xf32>
    tpu.vector_store %arg10[%c0_34, %c0_35, %c0_36], %68 {strides = array<i32>} : memref<1x32x128xf32, #tpu.memory_space<vmem>>, vector<1x32x128xf32>,
    return
  }
  func.func @transform_0(%arg0: i32, %arg1: i32) -> (i32, i32, i32) {
    %c0_i32 = arith.constant 0 : i32
    %c0_i32_0 = arith.constant 0 : i32
    %c0_i32_1 = arith.constant 0 : i32
    return %arg0, %c0_i32, %c0_i32_0 : i32, i32, i32
  }
  func.func @transform_1(%arg0: i32, %arg1: i32) -> (i32, i32) {
    %c0_i32 = arith.constant 0 : i32
    %c0_i32_0 = arith.constant 0 : i32
    %c0_i32_1 = arith.constant 0 : i32
    return %c0_i32, %c0_i32_0 : i32, i32
  }
  func.func @transform_2(%arg0: i32, %arg1: i32) -> (i32, i32) {
    %c0_i32 = arith.constant 0 : i32
    %c0_i32_0 = arith.constant 0 : i32
    %c0_i32_1 = arith.constant 0 : i32
    return %c0_i32, %c0_i32_0 : i32, i32
  }
  func.func @transform_3(%arg0: i32, %arg1: i32) -> (i32, i32) {
    %c0_i32 = arith.constant 0 : i32
    %c0_i32_0 = arith.constant 0 : i32
    %c0_i32_1 = arith.constant 0 : i32
    return %c0_i32, %c0_i32_0 : i32, i32
  }
  func.func @transform_4(%arg0: i32, %arg1: i32) -> (i32, i32) {
    %c0_i32 = arith.constant 0 : i32
    %c0_i32_0 = arith.constant 0 : i32
    %c0_i32_1 = arith.constant 0 : i32
    return %c0_i32, %c0_i32_0 : i32, i32
  }
  func.func @transform_5(%arg0: i32, %arg1: i32) -> (i32, i32) {
    %c0_i32 = arith.constant 0 : i32
    %c0_i32_0 = arith.constant 0 : i32
    %c0_i32_1 = arith.constant 0 : i32
    return %c0_i32, %c0_i32_0 : i32, i32
  }
  func.func @transform_6(%arg0: i32, %arg1: i32) -> (i32, i32) {
    %c0_i32 = arith.constant 0 : i32
    %c0_i32_0 = arith.constant 0 : i32
    %c0_i32_1 = arith.constant 0 : i32
    return %c0_i32, %c0_i32_0 : i32, i32
  }
  func.func @transform_7(%arg0: i32, %arg1: i32) -> (i32, i32) {
    %c0_i32 = arith.constant 0 : i32
    %c0_i32_0 = arith.constant 0 : i32
    %c0_i32_1 = arith.constant 0 : i32
    return %c0_i32, %c0_i32_0 : i32, i32
  }
  func.func @transform_8(%arg0: i32, %arg1: i32) -> (i32, i32, i32) {
    %c0_i32 = arith.constant 0 : i32
    %c0_i32_0 = arith.constant 0 : i32
    return %arg0, %arg1, %c0_i32 : i32, i32, i32
  }
}

</mosaic_0001>

<bundles_post_ra>
// kernel: tpu_custom_call.1
= control target key start
LH: loop header
LB: loop body
LE: loop exit
PB: predicated region body
PF: predicated region fallthrough
CT: control target
= control target key end

     0   :  { %13 = vsyncpa [#allocation6], 0  ;;  %s3141_s0 = inlined_call_operand.vmem [shape: f32[2,64,128], index: 0, kind: input, shape index: {}]   ;;  %s3142_s1 = inlined_call_operand.vmem [shape: f32[1,128], index: 1, kind: input, shape index: {}]   ;;  %s3143_s2 = inlined_call_operand.vmem [shape: f32[1,128], index: 2, kind: input, shape index: {}]   ;;  %s3144_s3 = inlined_call_operand.vmem [shape: f32[128,32], index: 3, kind: input, shape index: {}]   ;;  %s3145_s4 = inlined_call_operand.vmem [shape: bf16[128,32], index: 4, kind: input, shape index: {}]   ;;  %s3146_s5 = inlined_call_operand.vmem [shape: bf16[128,64], index: 5, kind: input, shape index: {}]   ;;  %s3147_s6 = inlined_call_operand.vmem [shape: bf16[32,128], index: 6, kind: input, shape index: {}]   ;;  %s3148_s7 = inlined_call_operand.vmem [shape: f32[1,128], index: 7, kind: input, shape index: {}]   ;;  %s3149_s8 = inlined_call_operand.hbm [shape: f32[2,64,128], index: 8, kind: output, shape index: {}]  }
   0x1   :  { %15 = vsyncpa [#allocation6 + $0x1], 0  ;;  %s2563_s27 = smov 0   ;;  %s2565_s28 = smov 0  }
   0x2   :  { %s2567_s29 = smov 0   ;;  %s2569_s30 = smov 0  }
   0x3   :  { %s2571_s9 = smov 0   ;;  %s2573_s10 = smov 0  }
   0x4   :  { %s2575_s11 = smov 0   ;;  %s2577_s12 = smov 0  }
   0x5 LB: > { %3155 = sst [smem:[#allocation8_spill]] %s2499_s10  ;;  %s1709_s13 = sadd.s32 4294967295, %s2507_s12   ;;  %s2507_s12 = sphi %s2577_s12, %s21_s12   ;;  %s2503_s11 = sphi %s2575_s11, %s3167_s11   ;;  %s2499_s10 = sphi %s2573_s10, %s3166_s10   ;;  %s2495_s9 = sphi %s2571_s9, %s3165_s9   ;;  %s2491_s30 = sphi %s2569_s30, %s3164_s30   ;;  %s2487_s29 = sphi %s2567_s29, %s3170_s29   ;;  %s2483_s28 = sphi %s2565_s28, %s3169_s28   ;;  %s2479_s27 = sphi %s2563_s27, %s3168_s27  }
   0x6   : > { %3156 = sst [smem:[#allocation9_spill]] %s2503_s11  ;;  %s1710_s14 = sadd.s32 4294967294, %s2507_s12  }
   0x7   : > { %s30_s15 = sadd.s32 1, %s2499_s10  ;;  %s33_s16 = sadd.s32 1, %s2503_s11 }
   0x8   : > { %p31_p0 = scmp.ge.s32.totalorder %s30_s15, 2  ;;  %p225_p1 = scmp.ne.s32.totalorder %s2487_s29, %s2483_s28 }
   0x9   : > { %p226_p2 = scmp.eq.s32.totalorder %s1709_s13, 3  ;;  %p231_p5 = scmp.ne.s32.totalorder %s2483_s28, %s2479_s27 }
   0xa   : > { %s3172_s15 = smov (%p31_p0, %s30_s15), 0  ;;  %s3174_s16 = smov (!%p31_p0, %s33_s16), %s2503_s11 }
   0xb   : > { %3157 = sst [smem:[#allocation10_spill]] %s3172_s15  ;;  %s211_s17 = ssub.s32 %s2499_s10, %s3172_s15 }
   0xc   : > { %p2614_p3 = por %p226_p2, %p225_p1  ;;  %p35_p4 = scmp.ge.s32.totalorder %s3174_s16, 2 }
   0xd   : > { %p232_p6 = scmp.eq.s32.totalorder %s1710_s14, 3  ;;  %p1713_p7 = scmp.ge.s32.totalorder %s2507_s12, 1 }
   0xe   : > { %s3176_s16 = smov (%p35_p4, %s3174_s16), 0  ;;  %p279_p9 = scmp.lt.s32.totalorder %s2507_s12, 5 }
   0xf   : > { %3159 = sst [smem:[#allocation11_spill]] %s3176_s16  ;;  %p2623_p8 = por %p232_p6, %p231_p5 }
  0x10   : > { %s210_s20 = ssub.s32 %s2503_s11, %s3176_s16  ;;  %s215_s21 = sadd.s32 1, %s2487_s29 }
  0x11   : > { %s212_s22 = sor.u32 %s211_s17, %s210_s20  ;;  %p280_p10 = pnand %p1713_p7, %p279_p9 }
  0x12   : > { %p213_p11 = scmp.eq.s32.totalorder %s212_s22, 0  ;;  %s3154_s24 = sand.u32 (!%p280_p10), 1, %s2483_s28  }
  0x13   : > { %283 = sbr.rel (%p280_p10) target bundleno = 2518 (0x9d6), region = 52  ;;  %p313_p12 = scmp.lt.s32.totalorder (!%p280_p10), %s2495_s9, 1 }
  0x14   : > { %s2632_s23 = scalar_select %p213_p11, %s2487_s29, %s215_s21  }
  0x15   : > { %s1714_s25 = sshll.u32 (!%p280_p10), %s3154_s24, 5  ;;  %s1717_s26 = sshll.u32 (!%p280_p10), %s2491_s30, 5 }
  0x16   : > { %s2645_s20 = scalar_lea.vmem (!%p280_p10), [#allocation5], %s1714_s25  ;;  %p1718_p13 = scmp.ne.s32.totalorder (!%p280_p10), %s2491_s30, 0 }
  0x1a   : > { %s314_s13 = scalar_select %p313_p12, %s2495_s9, 1 }
  0x1b   : > { %324 = sbr.rel (%p1718_p13) target bundleno = 1195 (0x4ab), region = 56  ;;  %v333_v0 = vld [vmem:[%s3144_s3] sm:$0xff] (!%p1718_p13)  ;;  %v334_v1 = vld [vmem:[%s3144_s3 + $0x8] sm:$0xff] (!%p1718_p13)  ;;  %v335_v2 = vld [vmem:[%s3144_s3 + $0x10] sm:$0xff] (!%p1718_p13)  ;;  %v2509_v3 = vmov (!%p1718_p13), 0.0|0.0   ;;  %vm2510_vm0 = vmmov (!%p1718_p13), 0   ;;  %v556_v51 = vlaneseq (!%p1718_p13) }
  0x1c   : > { %s1793_s14 = sshll.u32 %s314_s13, 6  ;;  %2158 = vmatprep.subr.bf16.mxu0 (!%p1718_p13), %v2509_v3  ;;  %v2658_v4 = vpack.c.bf16 (!%p1718_p13), %v334_v1, %v333_v0  ;;  %v336_v5 = vld [vmem:[%s3144_s3 + $0x18] sm:$0xff] (!%p1718_p13)  ;;  %v2511_v6 = vmov (!%p1718_p13), 0.0   ;;  %2182 = vmatprep.subr.bf16.mxu1 (!%p1718_p13), %v2509_v3  ;;  %v337_v8 = vld [vmem:[%s3144_s3 + $0x20] sm:$0xff] (!%p1718_p13)  ;;  %v338_v9 = vld [vmem:[%s3144_s3 + $0x28] sm:$0xff] (!%p1718_p13)  ;;  %vm434_vm1 = vcmask (!%p1718_p13), 261120  }
  0x1d   : > { %s2643_s17 = scalar_lea.vmem %s3141_s0, %s1793_s14  ;;  %1946 = vmatprep.mubr.msk.f32.mxu0 (!%p1718_p13), %vm2510_vm0, %v2511_v6  ;;  %1981 = vmatprep.mubr.msk.f32.mxu1 (!%p1718_p13), %vm2510_vm0, %v2511_v6  ;;  %v2669_v7 = vpack.c.bf16 (!%p1718_p13), %v336_v5, %v335_v2  ;;  %v339_v12 = vld [vmem:[%s3144_s3 + $0x30] sm:$0xff] (!%p1718_p13)  ;;  %v2693_v15 = vpack.c.bf16 (!%p1718_p13), %v338_v9, %v337_v8  ;;  %v340_v16 = vld [vmem:[%s3144_s3 + $0x38] sm:$0xff] (!%p1718_p13)  ;;  %vm2708_vm2 = vmpackc.low (!%p1718_p13), %vm434_vm1, %vm434_vm1  ;;  %v2822_v52 = vshrl.u32 (!%p1718_p13), %v556_v51, 7  ;;  %vm917_vm3 = vcmask (!%p1718_p13), 523264  }
  0x1e   : > { %2160 = vmatpush3.bf16.msra.mxu0 (!%p1718_p13), %v2658_v4  ;;  %v2679_v10 = vld [vmem:[%s2643_s17] sm:$0xff] (!%p1718_p13)  ;;  %v2682_v11 = vld [vmem:[%s2643_s17 + $0x8] sm:$0xff] (!%p1718_p13)  ;;  %v2688_v13 = vld [vmem:[%s2643_s17 + $0x10] sm:$0xff] (!%p1718_p13)  ;;  %2185 = vmatpush3.bf16.xpose.msk.msra.mxu1 (!%p1718_p13), %vm2708_vm2, %v2658_v4  ;;  %v2727_v25 = vpack.c.bf16 (!%p1718_p13), %v340_v16, %v339_v12 }
  0x1f   : > { %2161 = vmatprep.subr.bf16.mxu0 (!%p1718_p13), %v2509_v3  ;;  %v349_v14 = vadd.f32 (!%p1718_p13), %v2682_v11, %v2679_v10  ;;  %v2699_v17 = vld [vmem:[%s2643_s17 + $0x18] sm:$0xff] (!%p1718_p13)  ;;  %v2702_v18 = vld [vmem:[%s2643_s17 + $0x20] sm:$0xff] (!%p1718_p13)  ;;  %v2713_v21 = vld [vmem:[%s2643_s17 + $0x28] sm:$0xff] (!%p1718_p13)  ;;  %2186 = vmatprep.subr.bf16.mxu1 (!%p1718_p13), %v2509_v3  ;;  %v558_v53 = vsub.s32 (!%p1718_p13), 0, %v2822_v52 }
  0x20   : > { %v341_v22 = vld [vmem:[%s3144_s3 + $0x40] sm:$0xff] (!%p1718_p13)  ;;  %v342_v23 = vld [vmem:[%s3144_s3 + $0x48] sm:$0xff] (!%p1718_p13)  ;;  %v2732_v27 = vld [vmem:[%s2643_s17 + $0x30] sm:$0xff] (!%p1718_p13) }
  0x21   : > { %v350_v19 = vadd.f32 (!%p1718_p13), %v349_v14, %v2688_v13  ;;  %v2736_v29 = vpack.c.bf16 (!%p1718_p13), %v342_v23, %v341_v22  ;;  %v2739_v30 = vld [vmem:[%s2643_s17 + $0x38] sm:$0xff] (!%p1718_p13)  ;;  %v343_v31 = vld [vmem:[%s3144_s3 + $0x50] sm:$0xff] (!%p1718_p13)  ;;  %v345_v36 = vld [vmem:[%s3144_s3 + $0x60] sm:$0xff] (!%p1718_p13) }
  0x22   : > { %2163 = vmatpush3.bf16.msra.mxu0 %v2669_v7  ;;  %v344_v32 = vld [vmem:[%s3144_s3 + $0x58] sm:$0xff]  ;;  %v346_v37 = vld [vmem:[%s3144_s3 + $0x68] sm:$0xff]  ;;  %v347_v41 = vld [vmem:[%s3144_s3 + $0x70] sm:$0xff] }
  0x23   : > { %2164 = vmatprep.subr.bf16.mxu0 %v2509_v3  ;;  %v351_v24 = vadd.f32 %v350_v19, %v2699_v17  ;;  %v2755_v35 = vpack.c.bf16 %v344_v32, %v343_v31  ;;  %v2765_v40 = vpack.c.bf16 %v346_v37, %v345_v36  ;;  %v348_v42 = vld [vmem:[%s3144_s3 + $0x78] sm:$0xff]  ;;  %v2367_v31 = vld [vmem:[%s3146_s5 + $0x30] sm:$0xff]  }
  0x24   : > { %v2779_v45 = vpack.c.bf16 %v348_v42, %v347_v41  ;;  %v2364_v20 = vld [vmem:[%s3146_s5 + $0x18] sm:$0xff]  }
  0x25   : > { %v352_v26 = vadd.f32 %v351_v24, %v2702_v18  ;;  %v2368_v32 = vld [vmem:[%s3146_s5 + $0x38] sm:$0xff]  }
  0x26   : > { %2166 = vmatpush3.bf16.msra.mxu0 %v2693_v15  ;;  %2189 = vmatpush3.bf16.xpose.msk.msra.mxu1 %vm2708_vm2, %v2669_v7 }
  0x27   : > { %2167 = vmatprep.subr.bf16.mxu0 %v2509_v3  ;;  %v353_v28 = vadd.f32 %v352_v26, %v2713_v21  ;;  %2190 = vmatprep.subr.bf16.mxu1 %v2509_v3 }
  0x29   : > { %v354_v33 = vadd.f32 %v353_v28, %v2732_v27 }
  0x2a   : > { %2169 = vmatpush3.bf16.msra.mxu0 %v2727_v25 }
  0x2b   : > { %2170 = vmatprep.subr.bf16.mxu0 %v2509_v3  ;;  %v355_v34 = vadd.f32 %v354_v33, %v2739_v30 }
  0x2d   : > { %v356_v38 = vrot.slane %v355_v34, 4 }
  0x2e   : > { %2172 = vmatpush3.bf16.msra.mxu0 %v2736_v29  ;;  %2193 = vmatpush3.bf16.xpose.msk.msra.mxu1 %vm2708_vm2, %v2693_v15 }
  0x2f   : > { %2173 = vmatprep.subr.bf16.mxu0 %v2509_v3  ;;  %v357_v39 = vadd.f32 %v356_v38, %v355_v34  ;;  %2194 = vmatprep.subr.bf16.mxu1 %v2509_v3  ;;  %v1753_v38 = vld [vmem:[%s3142_s1] ss:$0 sm:$0xff] }
  0x31   : > { %v358_v43 = vrot.slane %v357_v39, 2 }
  0x32   : > { %2175 = vmatpush3.bf16.msra.mxu0 %v2755_v35 }
  0x33   : > { %2176 = vmatprep.subr.bf16.mxu0 %v2509_v3  ;;  %v359_v44 = vadd.f32 %v358_v43, %v357_v39  ;;  %v1754_v43 = vld [vmem:[%s3143_s2] ss:$0 sm:$0xff] }
  0x35   : > { %v360_v46 = vrot.slane %v359_v44, 1 }
  0x36   : > { %2178 = vmatpush3.bf16.msra.mxu0 %v2765_v40  ;;  %2197 = vmatpush3.bf16.xpose.msk.msra.mxu1 %vm2708_vm2, %v2727_v25 }
  0x37   : > { %2179 = vmatprep.subr.bf16.mxu0 %v2509_v3  ;;  %v361_v47 = vadd.f32 %v360_v46, %v359_v44  ;;  %2198 = vmatprep.subr.bf16.mxu1 %v2509_v3 }
  0x3a   : > { %2181 = vmatpush3.bf16.msra.mxu0 %v2779_v45 }
  0x3b   : > { %2214 = vmatprep.subr.bf16.mxu0 %v2509_v3 }
  0x3d   : > { %1947 = vmatmul.mubr.f32.vlgmr.msra.gmra.mrb[0].mxu0 %v361_v47 }
  0x3e   : > { %2216 = vmatpush3.bf16.msra.mxu0 %v2658_v4  ;;  %2016 = vmatprep.mubr.msk.f32.mxu0 %vm2510_vm0, %v2511_v6 }
  0x3f   : > { %2217 = vmatprep.subr.bf16.mxu0 %v2509_v3  ;;  %2201 = vmatpush3.bf16.xpose.msk.msra.mxu1 %vm2708_vm2, %v2736_v29 }
  0x40   : > { %2202 = vmatprep.subr.bf16.mxu1 %v2509_v3 }
  0x42   : > { %2219 = vmatpush3.bf16.msra.mxu0 %v2669_v7 }
  0x43   : > { %2220 = vmatprep.subr.bf16.mxu0 %v2509_v3 }
  0x46   : > { %2222 = vmatpush3.bf16.msra.mxu0 %v2693_v15 }
  0x47   : > { %2223 = vmatprep.subr.bf16.mxu0 %v2509_v3  ;;  %2205 = vmatpush3.bf16.xpose.msk.msra.mxu1 %vm2708_vm2, %v2755_v35 }
  0x48   : > { %2206 = vmatprep.subr.bf16.mxu1 %v2509_v3 }
  0x4a   : > { %2225 = vmatpush3.bf16.msra.mxu0 %v2727_v25 }
  0x4b   : > { %2226 = vmatprep.subr.bf16.mxu0 %v2509_v3 }
  0x4e   : > { %2228 = vmatpush3.bf16.msra.mxu0 %v2736_v29 }
  0x4f   : > { %2229 = vmatprep.subr.bf16.mxu0 %v2509_v3  ;;  %2209 = vmatpush3.bf16.xpose.msk.msra.mxu1 %vm2708_vm2, %v2765_v40 }
  0x50   : > { %2210 = vmatprep.subr.bf16.mxu1 %v2509_v3 }
  0x52   : > { %2231 = vmatpush3.bf16.msra.mxu0 %v2755_v35 }
  0x53   : > { %2232 = vmatprep.subr.bf16.mxu0 %v2509_v3 }
  0x56   : > { %2234 = vmatpush3.bf16.msra.mxu0 %v2765_v40 }
  0x57   : > { %2235 = vmatprep.subr.bf16.mxu0 %v2509_v3  ;;  %2213 = vmatpush3.bf16.xpose.msk.msra.mxu1 %vm2708_vm2, %v2779_v45 }
  0x5a   : > { %2237 = vmatpush3.bf16.msra.mxu0 %v2779_v45 }
  0x5b   : > { %2238 = vmatprep.subr.bf16.mxu0 %v2509_v3 }
 0x110   : > { %v428_v48 = vpop.f32.mrb[0].mxu0 }
 0x111   : > { %v433_v49 = vmul.f32 0.015625, %v428_v48  ;;  %v1948_v50 = vpop.f32.mrb[1].mxu0 }
 0x113   : > { %1982 = vmatmul.mubr.msk.f32.vlgmr.msra.gmra.mrb[0].mxu1 %vm434_vm1, %v433_v49 }
 0x1e6   : > { %v552_v54 = vpop.f32.mrb[0].mxu1 }
 0x1e7   : > { %v559_v55 = vrot.slane %v552_v54, %v558_v53  ;;  %v1983_v56 = vpop.f32.mrb[1].mxu1 }
 0x1e9   : > { %v2828_v57 = vsub.f32 %v2679_v10, %v559_v55  ;;  %v2831_v58 = vsub.f32 %v2682_v11, %v559_v55  ;;  %v2834_v59 = vsub.f32 %v2688_v13, %v559_v55  ;;  %v2837_v60 = vsub.f32 %v2699_v17, %v559_v55 }
 0x1ea   : > { %v2844_v63 = vsub.f32 %v2702_v18, %v559_v55  ;;  %v2849_v2 = vsub.f32 %v2713_v21, %v559_v55  ;;  %v2854_v9 = vsub.f32 %v2732_v27, %v559_v55  ;;  %v2859_v12 = vsub.f32 %v2739_v30, %v559_v55  ;;  %v2366_v30 = vld [vmem:[%s3146_s5 + $0x28] sm:$0xff]  }
 0x1eb   : > { %v568_v61 = vmul.f32 %v2828_v57, %v2828_v57  ;;  %v569_v62 = vmul.f32 %v2831_v58, %v2831_v58  ;;  %v570_v0 = vmul.f32 %v2834_v59, %v2834_v59  ;;  %v571_v5 = vmul.f32 %v2837_v60, %v2837_v60 }
 0x1ec   : > { %v572_v10 = vmul.f32 %v2844_v63, %v2844_v63  ;;  %v573_v13 = vmul.f32 %v2849_v2, %v2849_v2  ;;  %v574_v16 = vmul.f32 %v2854_v9, %v2854_v9  ;;  %v575_v18 = vmul.f32 %v2859_v12, %v2859_v12 }
 0x1ed   : > { %v576_v1 = vadd.f32 %v569_v62, %v568_v61 }
 0x1ef   : > { %v577_v8 = vadd.f32 %v576_v1, %v570_v0 }
 0x1f1   : > { %v578_v11 = vadd.f32 %v577_v8, %v571_v5 }
 0x1f3   : > { %v579_v14 = vadd.f32 %v578_v11, %v572_v10 }
 0x1f5   : > { %v580_v17 = vadd.f32 %v579_v14, %v573_v13 }
 0x1f7   : > { %v581_v19 = vadd.f32 %v580_v17, %v574_v16 }
 0x1f9   : > { %v582_v21 = vadd.f32 %v581_v19, %v575_v18 }
 0x1fb   : > { %v583_v22 = vrot.slane %v582_v21, 4 }
 0x1fd   : > { %v584_v23 = vadd.f32 %v583_v22, %v582_v21 }
 0x1ff   : > { %v585_v24 = vrot.slane %v584_v23, 2 }
 0x201   : > { %v586_v26 = vadd.f32 %v585_v24, %v584_v23 }
 0x203   : > { %v587_v27 = vrot.slane %v586_v26, 1 }
 0x205   : > { %v588_v28 = vadd.f32 %v587_v27, %v586_v26 }
 0x207   : > { %2017 = vmatmul.mubr.f32.vlgmr.msra.gmra.mrb[2].mxu0 %v588_v28 }
 0x208   : > { %2241 = vmatpush3.bf16.xpose.msk.msra.mxu0 %vm2708_vm2, %v2658_v4  ;;  %2051 = vmatprep.mubr.msk.f32.mxu0 %vm2510_vm0, %v2511_v6  ;;  %v2361_v4 = vld [vmem:[%s3146_s5] sm:$0xff]   ;;  %v2362_v6 = vld [vmem:[%s3146_s5 + $0x8] sm:$0xff]  }
 0x209   : > { %2242 = vmatprep.subr.bf16.mxu0 %v2509_v3  ;;  %2054 = vmatprep.subr.bf16.mxu1 %v2361_v4 }
 0x20a   : > { %2055 = vmatpush3.bf16.msra.mxu1 %v2361_v4 }
 0x20b   : > { %2056 = vmatprep.subr.bf16.mxu1 %v2362_v6 }
 0x20e   : > { %2057 = vmatpush3.bf16.msra.mxu1 %v2362_v6 }
 0x210   : > { %2245 = vmatpush3.bf16.xpose.msk.msra.mxu0 %vm2708_vm2, %v2669_v7 }
 0x211   : > { %2246 = vmatprep.subr.bf16.mxu0 %v2509_v3 }
 0x218   : > { %2249 = vmatpush3.bf16.xpose.msk.msra.mxu0 %vm2708_vm2, %v2693_v15 }
 0x219   : > { %2250 = vmatprep.subr.bf16.mxu0 %v2509_v3 }
 0x220   : > { %2253 = vmatpush3.bf16.xpose.msk.msra.mxu0 %vm2708_vm2, %v2727_v25 }
 0x221   : > { %2254 = vmatprep.subr.bf16.mxu0 %v2509_v3 }
 0x228   : > { %2257 = vmatpush3.bf16.xpose.msk.msra.mxu0 %vm2708_vm2, %v2736_v29  ;;  %v2365_v29 = vld [vmem:[%s3146_s5 + $0x20] sm:$0xff]  }
 0x229   : > { %2258 = vmatprep.subr.bf16.mxu0 %v2509_v3 }
 0x230   : > { %2261 = vmatpush3.bf16.xpose.msk.msra.mxu0 %vm2708_vm2, %v2755_v35 }
 0x231   : > { %2262 = vmatprep.subr.bf16.mxu0 %v2509_v3 }
 0x238   : > { %2265 = vmatpush3.bf16.xpose.msk.msra.mxu0 %vm2708_vm2, %v2765_v40 }
 0x239   : > { %2266 = vmatprep.subr.bf16.mxu0 %v2509_v3  ;;  %v2363_v3 = vld [vmem:[%s3146_s5 + $0x10] sm:$0xff]  }
 0x23a   : > { %2058 = vmatprep.subr.bf16.mxu1 %v2363_v3 }
 0x23b   : > { %2059 = vmatpush3.bf16.msra.mxu1 %v2363_v3 }
 0x23c   : > { %2060 = vmatprep.subr.bf16.mxu1 %v2364_v20 }
 0x23f   : > { %2061 = vmatpush3.bf16.msra.mxu1 %v2364_v20 }
 0x240   : > { %2269 = vmatpush3.bf16.xpose.msk.msra.mxu0 %vm2708_vm2, %v2779_v45  ;;  %2062 = vmatprep.subr.bf16.mxu1 %v2365_v29 }
 0x243   : > { %2063 = vmatpush3.bf16.msra.mxu1 %v2365_v29 }
 0x244   : > { %2064 = vmatprep.subr.bf16.mxu1 %v2366_v30 }
 0x247   : > { %2065 = vmatpush3.bf16.msra.mxu1 %v2366_v30 }
 0x248   : > { %2066 = vmatprep.subr.bf16.mxu1 %v2367_v31 }
 0x24b   : > { %2067 = vmatpush3.bf16.msra.mxu1 %v2367_v31 }
 0x24c   : > { %2068 = vmatprep.subr.bf16.mxu1 %v2368_v32 }
 0x24f   : > { %2069 = vmatpush3.bf16.msra.mxu1 %v2368_v32 }
 0x2da   : > { %v655_v7 = vpop.f32.mrb[2].mxu0 }
 0x2db   : > { %v659_v15 = vmul.f32 0.015625, %v655_v7  ;;  %v2018_v25 = vpop.f32.mrb[3].mxu0 }
 0x2dd   : > { %2052 = vmatmul.mubr.msk.f32.vlgmr.msra.gmra.mrb[4].mxu0 %vm434_vm1, %v659_v15 }
 0x3b0   : > { %v729_v33 = vpop.f32.mrb[4].mxu0 }
 0x3b1   : > { %v730_v34 = vadd.f32 1e-05, %v729_v33  ;;  %v2053_v35 = vpop.f32.mrb[5].mxu0 }
 0x3b3   : > { %2369 = vrsqrt.f32 %v730_v34 }
 0x3bd   : > { %v2370_v36 = vpop.eup %2369 }
 0x3be   : > { %v737_v37 = vrot.slane %v2370_v36, %v558_v53 }
 0x3c0   : > { %v738_v39 = vmul.f32 %v737_v37, %v2828_v57  ;;  %v739_v40 = vmul.f32 %v737_v37, %v2831_v58  ;;  %v740_v41 = vmul.f32 %v737_v37, %v2834_v59  ;;  %v741_v42 = vmul.f32 %v737_v37, %v2837_v60 }
 0x3c1   : > { %v742_v44 = vmul.f32 %v737_v37, %v2844_v63  ;;  %v743_v45 = vmul.f32 %v737_v37, %v2849_v2  ;;  %v744_v46 = vmul.f32 %v737_v37, %v2854_v9  ;;  %v745_v47 = vmul.f32 %v737_v37, %v2859_v12 }
 0x3c2   : > { %v753_v48 = vmul.f32 %v1753_v38, %v738_v39  ;;  %v754_v49 = vmul.f32 %v1753_v38, %v739_v40  ;;  %v755_v50 = vmul.f32 %v1753_v38, %v740_v41  ;;  %v756_v51 = vmul.f32 %v1753_v38, %v741_v42 }
 0x3c3   : > { %v757_v52 = vmul.f32 %v1753_v38, %v742_v44  ;;  %v758_v53 = vmul.f32 %v1753_v38, %v743_v45  ;;  %v759_v54 = vmul.f32 %v1753_v38, %v744_v46  ;;  %v760_v55 = vmul.f32 %v1753_v38, %v745_v47 }
 0x3c4   : > { %v768_v56 = vadd.f32 %v1754_v43, %v753_v48  ;;  %v769_v57 = vadd.f32 %v1754_v43, %v754_v49  ;;  %v770_v58 = vadd.f32 %v1754_v43, %v755_v50  ;;  %v771_v59 = vadd.f32 %v1754_v43, %v756_v51 }
 0x3c5   : > { %v772_v60 = vadd.f32 %v1754_v43, %v757_v52  ;;  %v773_v61 = vadd.f32 %v1754_v43, %v758_v53  ;;  %v774_v62 = vadd.f32 %v1754_v43, %v759_v54  ;;  %v775_v63 = vadd.f32 %v1754_v43, %v760_v55 }
 0x3c6   : > { %v776_v0 = vpack.c.bf16 %v769_v57, %v768_v56  ;;  %v777_v1 = vpack.c.bf16 %v771_v59, %v770_v58 }
 0x3c7   : > { %v778_v2 = vpack.c.bf16 %v773_v61, %v772_v60  ;;  %v779_v5 = vpack.c.bf16 %v775_v63, %v774_v62 }
 0x3c8   : > { %780 = vst [vmem:[#allocation2] sm:$0xff] %v776_v0  ;;  %2070 = vmatprep.mubr.bf16.mxu1 %v776_v0  ;;  %781 = vst [vmem:[#allocation2 + $0x8] sm:$0xff] %v777_v1 }
 0x3c9   : > { %2071 = vmatmul.mubr.bf16.vlgmr.msra.gmra.mrb[4].mxu1 %v777_v1  ;;  %782 = vst [vmem:[#allocation2 + $0x10] sm:$0xff] %v778_v2  ;;  %783 = vst [vmem:[#allocation2 + $0x18] sm:$0xff] %v779_v5 }
 0x3ca   : > { %2074 = vmatprep.mubr.bf16.mxu1 %v778_v2 }
 0x3d1   : > { %2075 = vmatmul.mubr.bf16.gmra.mrb[8].mxu1 %v779_v5 }
 0x49c   : > { %v2072_v8 = vpop.f32.mrb[4].mxu1 }
 0x49d   : > { %v882_v9 = vpop.f32.mrb[5].mxu1 }
 0x49e   : > { %v2073_v10 = vpop.f32.mrb[6].mxu1 }
 0x49f   : > { %v914_v11 = vpack.c.bf16 %v2073_v10, %v2072_v8  ;;  %v885_v12 = vpop.f32.mrb[7].mxu1 }
 0x4a0   : > { %v913_v13 = vpack.c.bf16 %v885_v12, %v882_v9 }
 0x4a1   : > { %919 = vst.msk [vmem:[#allocation3 + $0x8] sm:$0xff] %vm917_vm3, %v914_v11 }
 0x4a2   : > { %918 = vst.msk [vmem:[#allocation3] sm:$0xff] %vm917_vm3, %v913_v13 }
 0x4a4   : > { %v2076_v14 = vpop.f32.mrb[8].mxu1 }
 0x4a5   : > { %v898_v16 = vpop.f32.mrb[9].mxu1 }
 0x4a6   : > { %v2077_v17 = vpop.f32.mrb[10].mxu1 }
 0x4a7   : > { %v916_v18 = vpack.c.bf16 %v2077_v17, %v2076_v14  ;;  %v901_v19 = vpop.f32.mrb[11].mxu1 }
 0x4a8   : > { %v915_v21 = vpack.c.bf16 %v901_v19, %v898_v16 }
 0x4a9   : > { %921 = vst.msk [vmem:[#allocation3 + $0x18] sm:$0xff] %vm917_vm3, %v916_v18 }
 0x4aa   : > { %920 = vst.msk [vmem:[#allocation3 + $0x10] sm:$0xff] %vm917_vm3, %v915_v21 }
 0x4ab PF: > { %v2371_v22 = vld [vmem:[%s3145_s4] sm:$0xff]   ;;  %s922_s22 = sshra.s32 %s1717_s26, 4  ;;  %v2372_v23 = vld [vmem:[%s3145_s4 + $0x8] sm:$0xff]   ;;  %v2373_v24 = vld [vmem:[%s3145_s4 + $0x10] sm:$0xff]   ;;  %vm1059_vm4 = vcmask 130048   ;;  %s2512_s21 = smov 96  }
 0x4ac   : > { %2078 = vmatprep.subr.bf16.mxu0 %v2371_v22  ;;  %s1763_s16 = sshll.u32 %s922_s22, 3  ;;  %v2374_v26 = vld [vmem:[%s3145_s4 + $0x18] sm:$0xff]   ;;  %v2958_v28 = vld [vmem:[#allocation3] sm:$0xff]  ;;  %v2963_v6 = vld [vmem:[#allocation3 + $0x8] sm:$0xff]  ;;  %vm1127_vm5 = vcmask 523264   ;;  %s1788_s10 = sshll.u32 %s2491_s30, 2 }
 0x4ad   : > { %2079 = vmatpush3.bf16.msra.mxu0 %v2371_v22  ;;  %s2955_s14 = scalar_lea.vmem [#allocation2], %s1763_s16  ;;  %1326 = vrot.lane.b32.xlu0 %v2958_v28, %s2512_s21  ;;  %v1067_v4 = vsel %vm1059_vm4, %v2958_v28, 0  ;;  %v2375_v25 = vld [vmem:[%s3145_s4 + $0x20] sm:$0xff]   ;;  %v2376_v3 = vld [vmem:[%s3145_s4 + $0x28] sm:$0xff]   ;;  %v1070_v20 = vsel %vm1059_vm4, %v2963_v6, 0  ;;  %v2377_v29 = vld [vmem:[%s3145_s4 + $0x30] sm:$0xff]   ;;  %s1585_s24 = scalar_lea.vmem %s2643_s17, %s1717_s26 }
 0x4ae   : > { %2080 = vmatprep.subr.bf16.mxu0 %v2372_v23  ;;  %v926_v27 = vld [vmem:[%s2955_s14] sm:$0xff]  ;;  %2274 = vmatprep.subr.msk.bf16.mxu1 %vm1059_vm4, %v2958_v28  ;;  %v2378_v30 = vld [vmem:[%s3145_s4 + $0x38] sm:$0xff]   ;;  %v927_v32 = vld [vmem:[%s2955_s14 + $0x8] sm:$0xff]  ;;  %s2514_s14 = smov 80   ;;  %s1789_s11 = sshll.u32 %s2495_s9, 3 }
 0x4af   : > { %2094 = vmatprep.mubr.bf16.mxu0 %v926_v27  ;;  %2099 = vmatpush3.bf16.xpose.msra.mxu1 %v1067_v4  ;;  %s1629_s9 = sshll.u32 %s2645_s20, 4  ;;  %s3163_s13 = sand.u32 1, %s2483_s28   ;;  %s3082_s9 = int_to_ptr.vmem [resolvable:$true] %s1629_s9 }
 0x4b0   : > { %v2970_v15 = vld [vmem:[#allocation3 + $0x18] sm:$0xff]  ;;  %2275 = vmatprep.subr.msk.bf16.mxu1 %vm1059_vm4, %v2963_v6  ;;  %s3089_s15 = scalar_lea.sflag [#allocation6], %s3163_s13  ;;  %s2413_s16 = scalar_lea.vmem %s3082_s9, 512 }
 0x4b1   : > { %2081 = vmatpush3.bf16.msra.mxu0 %v2372_v23  ;;  %v2965_v7 = vld [vmem:[#allocation3 + $0x10] sm:$0xff]  ;;  %1328 = vrot.lane.b32.xlu0 %v2963_v6, %s2512_s21  ;;  %v1076_v33 = vsel %vm1059_vm4, %v2970_v15, 0  ;;  %p2414_p0 = scmp.ne.s32.totalorder %s3082_s9, %s2413_s16 }
 0x4b2   : > { %2082 = vmatprep.subr.bf16.mxu0 %v2373_v24  ;;  %1330 = vrot.lane.b32.xlu1 %v2965_v7, %s2512_s21  ;;  %v1073_v31 = vsel %vm1059_vm4, %v2965_v7, 0 }
 0x4b3   : > { %p2415_p1 = pnand %p2414_p0, %p2614_p3 }
 0x4b5   : > { %2083 = vmatpush3.bf16.msra.mxu0 %v2373_v24  ;;  %p2416_p2 = pneg %p2415_p1 }
 0x4b6   : > { %2084 = vmatprep.subr.bf16.mxu0 %v2374_v26  ;;  %1332 = vrot.lane.b32.xlu1 %v2970_v15, %s2512_s21  ;;  %s2513_s21 = smov 112  }
 0x4b7   : > { %2101 = vmatpush3.bf16.xpose.msra.mxu1 %v1070_v20 }
 0x4b8   : > { %2276 = vmatprep.subr.msk.bf16.mxu1 %vm1059_vm4, %v2965_v7 }
 0x4b9   : > { %2085 = vmatpush3.bf16.msra.mxu0 %v2374_v26 }
 0x4ba   : > { %2086 = vmatprep.subr.bf16.mxu0 %v2375_v25 }
 0x4bd   : > { %2087 = vmatpush3.bf16.msra.mxu0 %v2375_v25 }
 0x4be   : > { %2088 = vmatprep.subr.bf16.mxu0 %v2376_v3 }
 0x4bf   : > { %2103 = vmatpush3.bf16.xpose.msra.mxu1 %v1073_v31 }
 0x4c0   : > { %2277 = vmatprep.subr.msk.bf16.mxu1 %vm1059_vm4, %v2970_v15 }
 0x4c1   : > { %2089 = vmatpush3.bf16.msra.mxu0 %v2376_v3 }
 0x4c2   : > { %2090 = vmatprep.subr.bf16.mxu0 %v2377_v29 }
 0x4c5   : > { %2091 = vmatpush3.bf16.msra.mxu0 %v2377_v29 }
 0x4c6   : > { %2092 = vmatprep.subr.bf16.mxu0 %v2378_v30 }
 0x4c7   : > { %2105 = vmatpush3.bf16.xpose.msra.mxu1 %v1076_v33 }
 0x4c9   : > { %2093 = vmatpush3.bf16.msra.mxu0 %v2378_v30 }
 0x4cc   : > { %2095 = vmatmul.mubr.bf16.vlgmr.msra.gmra.mrb[0].mxu0 %v927_v32  ;;  %v2379_v32 = vld [vmem:[%s3147_s6] sm:$0xff]  }
 0x51f   : > { %v1327_v34 = vpop.permute.xlu0 %1326 }
 0x520   : > { %2278 = vmatprep.subr.msk.bf16.mxu1 %vm1059_vm4, %v1327_v34  ;;  %v1341_v41 = vsel %vm1059_vm4, %v1327_v34, 0 }
 0x523   : > { %v1329_v42 = vpop.permute.xlu0 %1328 }
 0x524   : > { %v1344_v43 = vsel %vm1059_vm4, %v1329_v42, 0  ;;  %v1331_v44 = vpop.permute.xlu1 %1330 }
 0x525   : > { %v1347_v45 = vsel %vm1059_vm4, %v1331_v44, 0 }
 0x528   : > { %v1333_v46 = vpop.permute.xlu1 %1332 }
 0x529   : > { %v1350_v47 = vsel %vm1059_vm4, %v1333_v46, 0 }
 0x59f   : > { %v2096_v35 = vpop.f32.mrb[0].mxu0 }
 0x5a0   : > { %v1026_v36 = vpop.f32.mrb[1].mxu0 }
 0x5a1   : > { %v2097_v37 = vpop.f32.mrb[2].mxu0 }
 0x5a2   : > { %v1042_v38 = vpack.c.bf16 %v2097_v37, %v2096_v35  ;;  %v1029_v39 = vpop.f32.mrb[3].mxu0 }
 0x5a3   : > { %v1041_v40 = vpack.c.bf16 %v1029_v39, %v1026_v36 }
 0x5a4   : > { %1324 = vrot.lane.b32.xlu1 %v1042_v38, %s2513_s21 }
 0x5a5   : > { %1322 = vrot.lane.b32.xlu0 %v1041_v40, %s2513_s21  ;;  %2106 = vmatprep.mubr.msk.bf16.mxu1 %vm1059_vm4, %v1041_v40 }
 0x5a6   : > { %2107 = vmatmul.mubr.msk.bf16.vlgmr.msra.gmra.mrb[0].mxu1 %vm1059_vm4, %v1042_v38 }
 0x5a7   : > { %2129 = vmatpush3.bf16.xpose.msra.mxu1 %v1341_v41 }
 0x5a8   : > { %2279 = vmatprep.subr.msk.bf16.mxu1 %vm1059_vm4, %v1329_v42  ;;  %1174 = vrot.lane.b32.xlu1 %v2958_v28, %s2513_s21 }
 0x5ac   : > { %1178 = vrot.lane.b32.xlu1 %v2965_v7, %s2513_s21 }
 0x5af   : > { %2131 = vmatpush3.bf16.xpose.msra.mxu1 %v1344_v43 }
 0x5b0   : > { %2280 = vmatprep.subr.msk.bf16.mxu1 %vm1059_vm4, %v1331_v44 }
 0x5b7   : > { %2133 = vmatpush3.bf16.xpose.msra.mxu1 %v1347_v45 }
 0x5b8   : > { %2281 = vmatprep.subr.msk.bf16.mxu1 %vm1059_vm4, %v1333_v46 }
 0x5bf   : > { %2135 = vmatpush3.bf16.xpose.msra.mxu1 %v1350_v47 }
 0x616   : > { %v1325_v48 = vpop.permute.xlu1 %1324 }
 0x617   : > { %v1323_v49 = vpop.permute.xlu0 %1322 }
 0x618   : > { %2136 = vmatprep.mubr.msk.bf16.mxu1 %vm1059_vm4, %v1323_v49 }
 0x619   : > { %2137 = vmatmul.mubr.msk.bf16.vlgmr.msra.gmra.mrb[4].mxu1 %vm1059_vm4, %v1325_v48 }
 0x61a   : > { %v1175_v50 = vpop.permute.xlu1 %1174 }
 0x61b   : > { %2110 = vmatprep.subr.bf16.mxu0 %v1175_v50 }
 0x61c   : > { %2111 = vmatpush3.bf16.msra.mxu0 %v1175_v50 }
 0x61e   : > { %v1179_v2 = vpop.permute.xlu1 %1178 }
 0x679   : > { %v2108_v51 = vpop.f32.mrb[0].mxu1 }
 0x67a   : > { %v1112_v52 = vpop.f32.mrb[1].mxu1  ;;  %v1134_v53 = vsel %vm1127_vm5, %v2108_v51, -inf }
 0x67b   : > { %1135 = vmax.xlane.f32.xlu0 %v1134_v53  ;;  %v2109_v54 = vpop.f32.mrb[2].mxu1  ;;  %v1128_v57 = vsel %vm1127_vm5, %v1112_v52, -inf }
 0x67c   : > { %v1115_v55 = vpop.f32.mrb[3].mxu1  ;;  %v1137_v58 = vsel %vm1127_vm5, %v2109_v54, -inf }
 0x67d   : > { %v1131_v56 = vsel %vm1127_vm5, %v1115_v55, -inf }
 0x67e   : > { %1132 = vmax.xlane.f32.xlu1 %v1131_v56 }
 0x67f   : > { %1129 = vmax.xlane.f32.xlu0 %v1128_v57 }
 0x683   : > { %1138 = vmax.xlane.f32.xlu0 %v1137_v58 }
 0x68f   : > { %1180 = vrot.lane.b32.xlu1 %v2970_v15, %s2513_s21 }
 0x699   : > { %1176 = vrot.lane.b32.xlu0 %v2963_v6, %s2513_s21 }
 0x6ec   : > { %v3025_v59 = vpop.f32.mrb[4].mxu1 }
 0x6ed   : > { %v3027_v60 = vpop.f32.mrb[5].mxu1  ;;  %v1407_v61 = vsel %vm1127_vm5, %v3025_v59, -inf }
 0x6ee   : > { %v3031_v62 = vpop.f32.mrb[6].mxu1  ;;  %1408 = vmax.xlane.f32.xlu1 %v1407_v61  ;;  %v1401_v1 = vsel %vm1127_vm5, %v3027_v60, -inf }
 0x6ef   : > { %v1389_v63 = vpop.f32.mrb[7].mxu1  ;;  %v1410_v31 = vsel %vm1127_vm5, %v3031_v62, -inf }
 0x6f0   : > { %v1404_v0 = vsel %vm1127_vm5, %v1389_v63, -inf }
 0x6f1   : > { %1405 = vmax.xlane.f32.xlu0 %v1404_v0 }
 0x6f2   : > { %1402 = vmax.xlane.f32.xlu1 %v1401_v1 }
 0x708   : > { %v1136_v5 = vpop.xlane.xlu0 %1135 }
 0x709   : > { %v1142_v8 = vsub.f32 %v2108_v51, %v1136_v5 }
 0x70b   : > { %v1148_v9 = vmul.f32 1.442695, %v1142_v8  ;;  %v1133_v10 = vpop.xlane.xlu1 %1132 }
 0x70c   : > { %v1141_v11 = vsub.f32 %v1115_v55, %v1133_v10  ;;  %v1130_v12 = vpop.xlane.xlu0 %1129 }
 0x70d   : > { %2381 = vpow2.f32 %v1148_v9  ;;  %v1140_v13 = vsub.f32 %v1112_v52, %v1130_v12 }
 0x70e   : > { %v1146_v14 = vmul.f32 1.442695, %v1141_v11 }
 0x70f   : > { %v1144_v16 = vmul.f32 1.442695, %v1140_v13  ;;  %v1181_v24 = vpop.permute.xlu1 %1180  ;;  %v2380_v13 = vld [vmem:[%s3147_s6 + $0x8] sm:$0xff]  }
 0x710   : > { %2383 = vpow2.f32 %v1146_v14  ;;  %v1139_v17 = vpop.xlane.xlu0 %1138  ;;  %2152 = vmatprep.subr.bf16.mxu1 %v2380_v13 }
 0x711   : > { %2385 = vpow2.f32 %v1144_v16  ;;  %v1143_v18 = vsub.f32 %v2109_v54, %v1139_v17  ;;  %2153 = vmatpush3.bf16.msra.mxu1 %v2380_v13 }
 0x713   : > { %v1150_v19 = vmul.f32 1.442695, %v1143_v18 }
 0x714   : > { %v1177_v21 = vpop.permute.xlu0 %1176 }
 0x715   : > { %2387 = vpow2.f32 %v1150_v19  ;;  %2112 = vmatprep.subr.bf16.mxu0 %v1177_v21 }
 0x716   : > { %2113 = vmatpush3.bf16.msra.mxu0 %v1177_v21 }
 0x717   : > { %v2382_v22 = vpop.eup %2381  ;;  %2114 = vmatprep.subr.bf16.mxu0 %v1179_v2 }
 0x718   : > { %v1158_v23 = vsel %vm1127_vm5, %v2382_v22, 0.0 }
 0x719   : > { %1159 = vadd.xlane.f32.xlu0 %v1158_v23 }
 0x71a   : > { %v2384_v26 = vpop.eup %2383  ;;  %2115 = vmatpush3.bf16.msra.mxu0 %v1179_v2 }
 0x71b   : > { %v2386_v27 = vpop.eup %2385  ;;  %v1155_v4 = vsel %vm1127_vm5, %v2384_v26, 0.0  ;;  %2116 = vmatprep.subr.bf16.mxu0 %v1181_v24 }
 0x71c   : > { %1156 = vadd.xlane.f32.xlu1 %v1155_v4  ;;  %v1152_v25 = vsel %vm1127_vm5, %v2386_v27, 0.0  ;;  %v1168_v3 = vpack.c.bf16 %v2384_v26, %v2386_v27 }
 0x71d   : > { %1153 = vadd.xlane.f32.xlu0 %v1152_v25 }
 0x71e   : > { %2117 = vmatpush3.bf16.msra.mxu0 %v1181_v24  ;;  %2118 = vmatprep.mubr.msk.bf16.mxu0 %vm1127_vm5, %v1168_v3 }
 0x71f   : > { %v2388_v20 = vpop.eup %2387  ;;  %2122 = vmatprep.subr.bf16.mxu0 %v2379_v32 }
 0x720   : > { %v1161_v29 = vsel %vm1127_vm5, %v2388_v20, 0.0  ;;  %v1169_v30 = vpack.c.bf16 %v2388_v20, %v2382_v22 }
 0x721   : > { %1162 = vadd.xlane.f32.xlu0 %v1161_v29 }
 0x722   : > { %2119 = vmatmul.mubr.msk.bf16.vlgmr.msra.gmra.mrb[4].mxu0 %vm1127_vm5, %v1169_v30 }
 0x723   : > { %2123 = vmatpush3.bf16.msra.mxu0 %v2379_v32 }
 0x725   : > { %1411 = vmax.xlane.f32.xlu0 %v1410_v31 }
 0x72d   : > { %1443 = vrot.lane.b32.xlu1 %v2958_v28, %s2514_s14 }
 0x731   : > { %1447 = vrot.lane.b32.xlu1 %v2965_v7, %s2514_s14 }
 0x735   : > { %1449 = vrot.lane.b32.xlu1 %v2970_v15, %s2514_s14 }
 0x73b   : > { %1445 = vrot.lane.b32.xlu0 %v2963_v6, %s2514_s14  ;;  %s1626_s14 = sadd.s32 %s1789_s11, %s1788_s10  ;;  %s2515_s10 = smov [#allocation5]  }
 0x73c   : > { %s1790_s30 = sshll.u32 %s1626_s14, 7  ;;  %s2417_s11 = sshll.u32 %s2515_s10, 4  ;;  %s2418_s11 = int_to_ptr.vmem [resolvable:$false] %s2417_s11 }
 0x73d   : > { %s3080_s22 = scalar_lea.hbm %s3149_s8, %s1790_s30  ;;  %p2420_p4 = scmp.lt.s32.totalorder %s3082_s9, %s2418_s11 }
 0x77b   : > { %v1409_v33 = vpop.xlane.xlu1 %1408 }
 0x77c   : > { %v1415_v34 = vsub.f32 %v3025_v59, %v1409_v33 }
 0x77e   : > { %v1406_v35 = vpop.xlane.xlu0 %1405  ;;  %v1421_v7 = vmul.f32 1.442695, %v1415_v34 }
 0x77f   : > { %v1414_v36 = vsub.f32 %v1389_v63, %v1406_v35  ;;  %v1403_v37 = vpop.xlane.xlu1 %1402 }
 0x780   : > { %v1413_v28 = vsub.f32 %v3027_v60, %v1403_v37  ;;  %v1786_v37 = vld [vmem:[%s3148_s7] ss:$0 sm:$0xff] }
 0x781   : > { %v1419_v38 = vmul.f32 1.442695, %v1414_v36 }
 0x782   : > { %v1417_v39 = vmul.f32 1.442695, %v1413_v28 }
 0x783   : > { %2389 = vpow2.f32 %v1419_v38 }
 0x784   : > { %2391 = vpow2.f32 %v1417_v39 }
 0x785   : > { %2393 = vpow2.f32 %v1421_v7  ;;  %v1588_v7 = vld [vmem:[%s1585_s24 + $0x10] sm:$0xff] }
 0x78d   : > { %v2390_v6 = vpop.eup %2389 }
 0x78e   : > { %v2392_v15 = vpop.eup %2391  ;;  %v1428_v40 = vsel %vm1127_vm5, %v2390_v6, 0.0 }
 0x78f   : > { %1429 = vadd.xlane.f32.xlu1 %v1428_v40  ;;  %v1425_v41 = vsel %vm1127_vm5, %v2392_v15, 0.0  ;;  %v1441_v42 = vpack.c.bf16 %v2390_v6, %v2392_v15  ;;  %v2394_v43 = vpop.eup %2393  ;;  %v1586_v40 = vld [vmem:[%s1585_s24] sm:$0xff] }
 0x790   : > { %1426 = vadd.xlane.f32.xlu0 %v1425_v41  ;;  %v1431_v44 = vsel %vm1127_vm5, %v2394_v43, 0.0 }
 0x794   : > { %1432 = vadd.xlane.f32.xlu0 %v1431_v44  ;;  %v1589_v44 = vld [vmem:[%s1585_s24 + $0x18] sm:$0xff] }
 0x7a6   : > { %v1160_v45 = vpop.xlane.xlu0 %1159 }
 0x7a9   : > { %v1157_v46 = vpop.xlane.xlu1 %1156 }
 0x7aa   : > { %v1154_v47 = vpop.xlane.xlu0 %1153 }
 0x7ad   : > { %v1444_v48 = vpop.permute.xlu1 %1443 }
 0x7ae   : > { %v1163_v49 = vpop.xlane.xlu0 %1162  ;;  %2140 = vmatprep.subr.bf16.mxu0 %v1444_v48 }
 0x7b1   : > { %v1448_v11 = vpop.permute.xlu1 %1447 }
 0x7b2   : > { %v1412_v50 = vpop.xlane.xlu0 %1411 }
 0x7b3   : > { %v1416_v51 = vsub.f32 %v3031_v62, %v1412_v50 }
 0x7b5   : > { %v1423_v52 = vmul.f32 1.442695, %v1416_v51  ;;  %v1450_v12 = vpop.permute.xlu1 %1449 }
 0x7b6   : > { %v1446_v10 = vpop.permute.xlu0 %1445 }
 0x7b7   : > { %2395 = vpow2.f32 %v1423_v52 }
 0x7b8   : > { %2397 = vrcp.f32 %v1160_v45 }
 0x7b9   : > { %2399 = vrcp.f32 %v1154_v47 }
 0x7ba   : > { %2401 = vrcp.f32 %v1163_v49 }
 0x7bb   : > { %2403 = vrcp.f32 %v1157_v46 }
 0x7c1   : > { %v2396_v53 = vpop.eup %2395 }
 0x7c2   : > { %v1434_v54 = vsel %vm1127_vm5, %v2396_v53, 0.0  ;;  %v1442_v55 = vpack.c.bf16 %v2396_v53, %v2394_v43  ;;  %v2398_v56 = vpop.eup %2397 }
 0x7c3   : > { %1435 = vadd.xlane.f32.xlu0 %v1434_v54  ;;  %v2400_v58 = vpop.eup %2399 }
 0x7c4   : > { %v2402_v61 = vpop.eup %2401 }
 0x7c5   : > { %v2404_v62 = vpop.eup %2403 }
 0x7f5   : > { %v2120_v57 = vpop.f32.mrb[4].mxu0 }
 0x7f6   : > { %v1243_v59 = vmul.f32 %v2398_v56, %v2120_v57  ;;  %v1226_v60 = vpop.f32.mrb[5].mxu0 }
 0x7f7   : > { %v1241_v63 = vmul.f32 %v2400_v58, %v1226_v60  ;;  %v2121_v0 = vpop.f32.mrb[6].mxu0 }
 0x7f8   : > { %v1244_v1 = vmul.f32 %v2402_v61, %v2121_v0  ;;  %v1229_v2 = vpop.f32.mrb[7].mxu0 }
 0x7f9   : > { %v1242_v5 = vmul.f32 %v2404_v62, %v1229_v2 }
 0x7fa   : > { %v1246_v8 = vpack.c.bf16 %v1244_v1, %v1243_v59 }
 0x7fb   : > { %v1245_v9 = vpack.c.bf16 %v1242_v5, %v1241_v63 }
 0x7fd   : > { %2124 = vmatprep.mubr.msk.bf16.mxu0 %vm1059_vm4, %v1245_v9 }
 0x7fe   : > { %2125 = vmatmul.mubr.msk.bf16.vlgmr.msra.gmra.mrb[8].mxu0 %vm1059_vm4, %v1246_v8 }
 0x7ff   : > { %2141 = vmatpush3.bf16.msra.mxu0 %v1444_v48  ;;  %2148 = vmatprep.mubr.msk.bf16.mxu0 %vm1127_vm5, %v1441_v42  ;;  %v1587_v48 = vld [vmem:[%s1585_s24 + $0x8] sm:$0xff]  ;;  %s2419_s24 = scalar_lea.vmem %s2418_s11, 1024 }
 0x800   : > { %2142 = vmatprep.subr.bf16.mxu0 %v1446_v10  ;;  %p2421_p5 = scmp.lt.s32.totalorder %s2419_s24, %s2413_s16 }
 0x802   : > { %p2422_p6 = por %p2421_p5, %p2420_p4 }
 0x803   : > { %2143 = vmatpush3.bf16.msra.mxu0 %v1446_v10 }
 0x804   : > { %2144 = vmatprep.subr.bf16.mxu0 %v1448_v11  ;;  %p2423_p7 = pnand %p2422_p6, %p2416_p2 }
 0x807   : > { %2145 = vmatpush3.bf16.msra.mxu0 %v1448_v11 }
 0x808   : > { %2146 = vmatprep.subr.bf16.mxu0 %v1450_v12 }
 0x80b   : > { %2147 = vmatpush3.bf16.msra.mxu0 %v1450_v12 }
 0x80e   : > { %2149 = vmatmul.mubr.msk.bf16.vlgmr.msra.gmra.mrb[12].mxu0 %vm1127_vm5, %v1442_v55 }
 0x81c   : > { %v1430_v21 = vpop.xlane.xlu1 %1429 }
 0x81d   : > { %v1427_v14 = vpop.xlane.xlu0 %1426  ;;  %2405 = vrcp.f32 %v1430_v21 }
 0x821   : > { %v1433_v17 = vpop.xlane.xlu0 %1432 }
 0x822   : > { %2407 = vrcp.f32 %v1433_v17 }
 0x827   : > { %v2406_v24 = vpop.eup %2405 }
 0x82c   : > { %v2408_v27 = vpop.eup %2407 }
 0x850   : > { %v1436_v23 = vpop.xlane.xlu0 %1435 }
 0x851   : > { %2409 = vrcp.f32 %v1436_v23 }
 0x852   : > { %2411 = vrcp.f32 %v1427_v14 }
 0x85b   : > { %v2410_v25 = vpop.eup %2409 }
 0x85c   : > { %v2412_v20 = vpop.eup %2411 }
 0x8d1   : > { %v2126_v16 = vpop.f32.mrb[8].mxu0 }
 0x8d2   : > { %v1293_v18 = vpop.f32.mrb[9].mxu0 }
 0x8d3   : > { %v2127_v19 = vpop.f32.mrb[10].mxu0 }
 0x8d4   : > { %v1296_v22 = vpop.f32.mrb[11].mxu0 }
 0x8e1   : > { %v2150_v26 = vpop.f32.mrb[12].mxu0 }
 0x8e2   : > { %v1495_v4 = vpop.f32.mrb[13].mxu0  ;;  %v1512_v29 = vmul.f32 %v2408_v27, %v2150_v26 }
 0x8e3   : > { %v2151_v3 = vpop.f32.mrb[14].mxu0  ;;  %v1510_v32 = vmul.f32 %v2412_v20, %v1495_v4 }
 0x8e4   : > { %v1513_v30 = vmul.f32 %v2410_v25, %v2151_v3  ;;  %v1498_v31 = vpop.f32.mrb[15].mxu0 }
 0x8e5   : > { %v1511_v33 = vmul.f32 %v2406_v24, %v1498_v31 }
 0x8e6   : > { %v1515_v34 = vpack.c.bf16 %v1513_v30, %v1512_v29 }
 0x8e7   : > { %v1514_v35 = vpack.c.bf16 %v1511_v33, %v1510_v32 }
 0x8e9   : > { %2154 = vmatprep.mubr.msk.bf16.mxu1 %vm1059_vm4, %v1514_v35 }
 0x8ea   : > { %2155 = vmatmul.mubr.msk.bf16.vlgmr.msra.gmra.mrb[8].mxu1 %vm1059_vm4, %v1515_v34 }
 0x9bd   : > { %v2156_v36 = vpop.f32.mrb[8].mxu1 }
 0x9be   : > { %v1579_v28 = vadd.f32 %v2156_v36, %v2126_v16  ;;  %v1562_v38 = vpop.f32.mrb[9].mxu1 }
 0x9bf   : > { %v1577_v39 = vadd.f32 %v1562_v38, %v1293_v18  ;;  %v2157_v6 = vpop.f32.mrb[10].mxu1 }
 0x9c0   : > { %v1603_v15 = vadd.f32 %v1786_v37, %v1579_v28  ;;  %v1580_v41 = vadd.f32 %v2157_v6, %v2127_v19  ;;  %v1565_v42 = vpop.f32.mrb[11].mxu1 }
 0x9c1   : > { %v1601_v43 = vadd.f32 %v1786_v37, %v1577_v39  ;;  %v1578_v45 = vadd.f32 %v1565_v42, %v1296_v22 }
 0x9c2   : > { %v1607_v46 = vadd.f32 %v1603_v15, %v1588_v7  ;;  %v1604_v47 = vadd.f32 %v1786_v37, %v1580_v41 }
 0x9c3   : > { %v1605_v49 = vadd.f32 %v1601_v43, %v1586_v40  ;;  %v1602_v50 = vadd.f32 %v1786_v37, %v1578_v45 }
 0x9c4   : > { %1611 = vst [vmem:[%s2645_s20 + $0x10] sm:$0xff] %v1607_v46  ;;  %v1608_v51 = vadd.f32 %v1604_v47, %v1589_v44 }
 0x9c5   : > { %1609 = vst [vmem:[%s2645_s20] sm:$0xff] %v1605_v49  ;;  %v1606_v52 = vadd.f32 %v1602_v50, %v1587_v48 }
 0x9c6   : > { %1612 = vst [vmem:[%s2645_s20 + $0x18] sm:$0xff] %v1608_v51 }
 0x9c7   : > { %1610 = vst [vmem:[%s2645_s20 + $0x8] sm:$0xff] %v1606_v52 }
 0x9c8   : > { %2426 = shalt.err (!%p2423_p7)
}
 0x9c9   : > { %s2427_s20 = scalar_lea.hbm %s3080_s22, 512  ;;  %s2431_s14 = scalar_lea.hbm %s3149_s8, 2048 }
 0x9ca   : > { %p2428_p9 = scmp.ne.s32.totalorder %s3080_s22, %s2427_s20  ;;  %p2432_p12 = scmp.lt.u32.totalorder %s3080_s22, %s3149_s8 }
 0x9cb   : > { %p2433_p13 = scmp.lt.u32.totalorder %s2431_s14, %s2427_s20  ;;  %p2435_p1 = scmp.lt.u32.totalorder %s2427_s20, %s3080_s22 }
 0x9cc   : > { %p2429_p10 = pnand %p2428_p9, %p2614_p3 }
 0x9cd   : > { %p2434_p0 = por %p2433_p13, %p2432_p12 }
 0x9ce   : > { %p2430_p11 = pneg %p2429_p10 }
 0x9cf   : > { %p2436_p2 = por %p2435_p1, %p2434_p0 }
 0x9d1   : > { %p2437_p4 = pnand %p2436_p2, %p2430_p11 }
 0x9d3   : > { %2440 = shalt.err (!%p2437_p4)
}
 0x9d4   : > { %s2516_s17 = smov 128   ;;  %s2517_s13 = smov 8  }
 0x9d5   : > { %2282 = dma.vmem_to_hbm [thread:$0]  (%p2614_p3), %s3082_s9, 512, %s3080_s22, %s3089_s15, %s2516_s17, %s2516_s17, %s2517_s13  }
 0x9d6 PF: > { %p2288_p5 = scmp.ge.s32.totalorder %s2507_s12, 2  ;;  %s1644_s16 = sand.u32 1, %s2479_s27  }
 0x9d7   : > { %s1645_s10 = scalar_lea.sflag [#allocation6], %s1644_s16 }
 0x9d8   : > { %p2285_p6 = pnand %p2288_p5, %p2623_p8 }
 0x9da   : > { %2474 = dma.done.wait (!%p2285_p6), %s1645_s10, 512  }
 0x9db   : > { %2476 = vsyncadd (!%p2285_p6), %s1645_s10, 4294966784  ;;  %s21_s12 = sadd.s32 1, %s2507_s12   ;;  %s3164_s30 = sld [smem:[#allocation8_spill]] }
 0x9dc   : > { %p18_p7 = scmp.ge.s32.totalorder %s21_s12, 6   ;;  %s3165_s9 = sld [smem:[#allocation9_spill]] }
 0x9dd   : > { %s3166_s10 = sld [smem:[#allocation10_spill]]  ;;  %s3167_s11 = sld [smem:[#allocation11_spill]] }
 0x9de   : > { %s3168_s27 = smov %s2483_s28  ;;  %s3169_s28 = smov %s2487_s29 }
 0x9df   : > { %s3170_s29 = smov %s2632_s23  ;;  %20 = sbr.rel (!%p18_p7) target bundleno = 5 (0x5), region = 93 }
 0x9e6   :  { %1650 = vsyncpa [#allocation6], 1 }
 0x9e7   :  { %1652 = vsyncpa [#allocation6 + $0x1], 1 }

</bundles_post_ra>
